<compile_context>
chip_gen: v5e
topology: v5e:2x2
jax: 0.10.0
libtpu: 0.0.40
codegen_flags: <defaults>
</compile_context>

<pallas_src>
import jax
import jax.numpy as jnp
from jax import lax
from jax.experimental import pallas as pl
from jax.experimental.pallas import tpu as pltpu

EPS = 1e-5
LANE = 128           # channel axes padded to a lane-dense multiple of 128
ROW_TARGET = 512     # ~rows per in-kernel matmul chunk (keeps MXU M large)


def _round_up(n, m):
    return ((n + m - 1) // m) * m


def _vmem_limit_bytes():
    # Generation-aware scoped-VMEM limit (v5e/v6e: 128 MiB, v7x: 64 MiB).
    cap = 64 * 1024 * 1024
    try:
        cap = int(pltpu.get_tpu_info().vmem_capacity_bytes)
    except Exception:
        pass
    return max(32 * 1024 * 1024, min(int(cap * 0.7), 100 * 1024 * 1024))


# --------------------------------------------------------------------------
# Fused per-image body kernel
# --------------------------------------------------------------------------
def _make_block_kernel(H, W, Ho, Wo, s, Cp, Wp, Op, proj, sep_sc,
                       in_row_chunk, out_row_chunk):
    """conv1(1x1)+bn1+relu -> padded VMEM scratch -> conv2(3x3, stride s)
       +bn2+relu -> conv3(1x1)+bn3 -> (+shortcut) -> relu, all per image."""

    def _tap_h(r0, rc, kh):
        start = s * r0 + kh
        return pl.ds(start, rc) if s == 1 else pl.ds(start, rc, stride=s)

    def _tap_w(kw):
        return pl.ds(kw, Wo) if s == 1 else pl.ds(kw, Wo, stride=s)

    def _body(x_ref, w1_ref, b1_ref, w2_ref, b2_ref, w3_ref, b3_ref,
              sc_ref, wsc_ref, bsc_ref, o_ref, hp_sc):
        # --- conv1 (1x1) + bn1 + relu into the spatially padded VMEM scratch
        #     (zero borders provide the 3x3 'same' padding; no HBM pad copy).
        hp_sc[...] = jnp.zeros_like(hp_sc)
        for h0 in range(0, H, in_row_chunk):
            hr = min(in_row_chunk, H - h0)
            xb = x_ref[0, pl.ds(h0, hr), :, :].reshape(hr * W, Cp)
            h1 = jnp.dot(xb.astype(jnp.bfloat16), w1_ref[...],
                         preferred_element_type=jnp.float32)
            h1 = jnp.maximum(h1 + b1_ref[...], 0.0)
            hp_sc[pl.ds(h0 + 1, hr), pl.ds(1, W), :] = h1.reshape(hr, W, Wp)

        # --- conv2 (3x3, stride s) + bn2 + relu -> conv3 (1x1) + bn3
        #     -> shortcut add -> relu, chunked over output rows.
        #     The 3x3 is 9 accumulated bf16 MXU dots (no patch slab).
        for r0 in range(0, Ho, out_row_chunk):
            rc = min(out_row_chunk, Ho - r0)
            mo = rc * Wo
            acc = jnp.zeros((mo, Wp), jnp.float32)
            for kh in range(3):
                for kw in range(3):
                    tap = hp_sc[_tap_h(r0, rc, kh), _tap_w(kw), :]
                    acc = acc + jnp.dot(
                        tap.reshape(mo, Wp).astype(jnp.bfloat16),
                        w2_ref[3 * kh + kw],
                        preferred_element_type=jnp.float32)
            h2 = jnp.maximum(acc + b2_ref[...], 0.0)
            out = jnp.dot(h2.astype(jnp.bfloat16), w3_ref[...],
                          preferred_element_type=jnp.float32) + b3_ref[...]

            xs = sc_ref[0, pl.ds(r0, rc), :, :].reshape(mo, Cp)
            if proj:
                sc = jnp.dot(xs.astype(jnp.bfloat16), wsc_ref[...],
                             preferred_element_type=jnp.float32) + bsc_ref[...]
            else:
                sc = xs                       # identity path: Cp == Op
            o_ref[0, pl.ds(r0, rc), :, :] = (
                jnp.maximum(out + sc, 0.0).reshape(rc, Wo, Op))

    if proj and sep_sc:
        def kernel(x_ref, xs_ref, w1_ref, b1_ref, w2_ref, b2_ref,
                   w3_ref, b3_ref, wsc_ref, bsc_ref, o_ref, hp_sc):
            _body(x_ref, w1_ref, b1_ref, w2_ref, b2_ref, w3_ref, b3_ref,
                  xs_ref, wsc_ref, bsc_ref, o_ref, hp_sc)
    elif proj:
        def kernel(x_ref, w1_ref, b1_ref, w2_ref, b2_ref,
                   w3_ref, b3_ref, wsc_ref, bsc_ref, o_ref, hp_sc):
            _body(x_ref, w1_ref, b1_ref, w2_ref, b2_ref, w3_ref, b3_ref,
                  x_ref, wsc_ref, bsc_ref, o_ref, hp_sc)
    else:
        def kernel(x_ref, w1_ref, b1_ref, w2_ref, b2_ref,
                   w3_ref, b3_ref, o_ref, hp_sc):
            _body(x_ref, w1_ref, b1_ref, w2_ref, b2_ref, w3_ref, b3_ref,
                  x_ref, None, None, o_ref, hp_sc)

    return kernel


# --------------------------------------------------------------------------
# BN folding / padding (glue)
# --------------------------------------------------------------------------
def _fold_bn(bn):
    gamma, beta, mean, var = bn
    scale = gamma / jnp.sqrt(var + EPS)
    return scale, beta - mean * scale


def _pad_mat(w, rows, cols):
    return jnp.zeros((rows, cols), jnp.float32).at[:w.shape[0], :w.shape[1]].set(w)


def _pad_vec(b, cols):
    return jnp.zeros((1, cols), jnp.float32).at[0, :b.shape[0]].set(b)


def init_params(key, inplanes, planes, stride, scale=4):
    width = int(planes * (scale / 4))
    cout = planes * 4  # expansion = 4
    keys = jax.random.split(key, 8)

    def bn_params(k, c):
        k1, k2, k3, k4 = jax.random.split(k, 4)
        gamma = jax.random.uniform(k1, (c,), jnp.float32, 0.5, 1.5)
        beta = jax.random.normal(k2, (c,), jnp.float32) * 0.1
        mean = jax.random.normal(k3, (c,), jnp.float32) * 0.1
        var = jax.random.uniform(k4, (c,), jnp.float32, 0.5, 1.5)
        return gamma, beta, mean, var

    p = {
        "w1": jax.random.normal(keys[0], (inplanes, width), jnp.float32) * 0.1,
        "w2": jax.random.normal(keys[1], (3, 3, width, width), jnp.float32) * 0.1,
        "w3": jax.random.normal(keys[2], (width, cout), jnp.float32) * 0.1,
        "bn1": bn_params(keys[3], width),
        "bn2": bn_params(keys[4], width),
        "bn3": bn_params(keys[5], cout),
    }
    if stride != 1 or inplanes != cout:
        p["wsc"] = jax.random.normal(keys[6], (inplanes, cout), jnp.float32) * 0.1
        p["bnsc"] = bn_params(keys[7], cout)
    return p


# --------------------------------------------------------------------------
# Forward pass (wrapper calling the fused Pallas kernel)
# --------------------------------------------------------------------------
def bottle2neck_forward(x_nchw, params, stride):
    N, Cin, H, W = x_nchw.shape
    width = params["w1"].shape[1]
    cout = params["w3"].shape[1]
    s = stride
    Ho = (H - 1) // s + 1
    Wo = (W - 1) // s + 1

    Cp = _round_up(Cin, LANE)
    Wp = _round_up(width, LANE)
    Op = _round_up(cout, LANE)

    proj = "wsc" in params
    if not proj:
        assert s == 1 and Cin == cout and Cp == Op, \
            "identity shortcut requires stride=1 and Cin == planes*4"
    sep_sc = proj and s != 1

    # NHWC with channel axes zero-padded to lane-dense multiples of 128.
    # TODO(synk): at production widths only the *output* lane axes need the
    #             128 padding; contraction (K) axes could stay unpadded.
    x = jnp.transpose(x_nchw, (0, 2, 3, 1)).astype(jnp.float32)
    xp = jnp.pad(x, ((0, 0), (0, 0), (0, 0), (0, Cp - Cin)))

    # Fold eval-mode BatchNorm into the conv weights/biases; weights -> bf16.
    s1, b1 = _fold_bn(params["bn1"])
    s2, b2 = _fold_bn(params["bn2"])
    s3, b3 = _fold_bn(params["bn3"])
    w1p = _pad_mat(params["w1"] * s1[None, :], Cp, Wp).astype(jnp.bfloat16)
    b1p = _pad_vec(b1, Wp)
    w2f = params["w2"] * s2[None, None, None, :]
    w2p = jnp.zeros((3, 3, Wp, Wp), jnp.float32).at[:, :, :width, :width].set(w2f)
    w2c = w2p.reshape(9, Wp, Wp).astype(jnp.bfloat16)
    b2p = _pad_vec(b2, Wp)
    w3p = _pad_mat(params["w3"] * s3[None, :], Wp, Op).astype(jnp.bfloat16)
    b3p = _pad_vec(b3, Op)

    # Row-chunk sizes: ~ROW_TARGET rows per in-kernel matmul keeps the MXU
    # pipeline full while capping live VMEM at production spatial sizes.
    in_row_chunk = max(1, min(H, ROW_TARGET // max(W, 1)))
    out_row_chunk = max(1, min(Ho, ROW_TARGET // max(Wo, 1)))

    kernel = _make_block_kernel(H, W, Ho, Wo, s, Cp, Wp, Op, proj, sep_sc,
                                in_row_chunk, out_row_chunk)

    def _resident(shape):
        nd = len(shape)
        # TODO(synk): pipeline_mode=pl.Buffered(1) would drop the pointless
        #             double-buffering of these static blocks (v7x VMEM).
        return pl.BlockSpec(shape, lambda n, _nd=nd: (0,) * _nd)

    in_specs = [pl.BlockSpec((1, H, W, Cp), lambda n: (n, 0, 0, 0))]
    args = [xp]
    if sep_sc:
        # Pre-subsampled shortcut input: 4x fewer DMA bytes at stride 2 and
        # no strided gathers for the shortcut inside the kernel.
        in_specs.append(pl.BlockSpec((1, Ho, Wo, Cp), lambda n: (n, 0, 0, 0)))
        args.append(xp[:, ::s, ::s, :])
    in_specs += [_resident((Cp, Wp)), _resident((1, Wp)),
                 _resident((9, Wp, Wp)), _resident((1, Wp)),
                 _resident((Wp, Op)), _resident((1, Op))]
    args += [w1p, b1p, w2c, b2p, w3p, b3p]
    if proj:
        ssc, bsc = _fold_bn(params["bnsc"])
        wscp = _pad_mat(params["wsc"] * ssc[None, :], Cp, Op).astype(jnp.bfloat16)
        bscp = _pad_vec(bsc, Op)
        in_specs += [_resident((Cp, Op)), _resident((1, Op))]
        args += [wscp, bscp]

    out = pl.pallas_call(
        kernel,
        out_shape=jax.ShapeDtypeStruct((N, Ho, Wo, Op), jnp.float32),
        grid=(N,),
        in_specs=in_specs,
        out_specs=pl.BlockSpec((1, Ho, Wo, Op), lambda n: (n, 0, 0, 0)),
        scratch_shapes=[pltpu.VMEM((H + 2, W + 2, Wp), jnp.float32)],
        compiler_params=pltpu.CompilerParams(
            dimension_semantics=("parallel",),
            vmem_limit_bytes=_vmem_limit_bytes()),
    )(*args)

    # TODO(synk): in a full network keep the padded NHWC layout between blocks
    #             and slice/transpose only once at the network boundary.
    out = out[:, :, :, :cout]
    return jnp.transpose(out, (0, 3, 1, 2))  # NCHW


# --------------------------------------------------------------------------
# Pure-JAX reference (lax.conv, f32) for correctness checking
# --------------------------------------------------------------------------
def reference_forward(x_nchw, params, stride):
    x = jnp.transpose(x_nchw, (0, 2, 3, 1)).astype(jnp.float32)
    dn = ("NHWC", "HWIO", "NHWC")
    Cin = x.shape[-1]
    width = params["w1"].shape[1]
    cout = params["w3"].shape[1]

    def bn(h, bnp):
        gamma, beta, mean, var = bnp
        return (h - mean) / jnp.sqrt(var + EPS) * gamma + beta

    h = lax.conv_general_dilated(x, params["w1"].reshape(1, 1, Cin, width),
                                 (1, 1), "VALID", dimension_numbers=dn)
    h = jax.nn.relu(bn(h, params["bn1"]))
    h = lax.conv_general_dilated(h, params["w2"], (stride, stride),
                                 ((1, 1), (1, 1)), dimension_numbers=dn)
    h = jax.nn.relu(bn(h, params["bn2"]))
    h = lax.conv_general_dilated(h, params["w3"].reshape(1, 1, width, cout),
                                 (1, 1), "VALID", dimension_numbers=dn)
    h = bn(h, params["bn3"])
    if "wsc" in params:
        sc = lax.conv_general_dilated(x, params["wsc"].reshape(1, 1, Cin, cout),
                                      (stride, stride), "VALID",
                                      dimension_numbers=dn)
        sc = bn(sc, params["bnsc"])
    else:
        sc = x
    return jnp.transpose(jax.nn.relu(h + sc), (0, 3, 1, 2))


# --------------------------------------------------------------------------
if __name__ == "__main__":
    key = jax.random.PRNGKey(0)
    k_x1, k_p1, k_x2, k_p2 = jax.random.split(key, 4)

    fwd = jax.jit(bottle2neck_forward, static_argnums=2)

    # bf16 MXU operands -> tolerance loosened vs. the f32 lax.conv reference.
    RTOL = ATOL = 3e-2

    # Config A: projection shortcut (stride=2, channel change)
    N, inplanes, planes, stride, Hs = 2, 8, 4, 2, 16
    x = jax.random.normal(k_x1, (N, inplanes, Hs, Hs), jnp.float32)
    params = init_params(k_p1, inplanes, planes, stride)
    out = jax.block_until_ready(fwd(x, params, stride))
    ref = reference_forward(x, params, stride)
    assert out.shape == (N, planes * 4, Hs // stride, Hs // stride)
    assert jnp.allclose(out, ref, rtol=RTOL, atol=ATOL), "projection path mismatch"

    # Config B: identity shortcut (stride=1, inplanes == planes*4)
    inplanes2, planes2, stride2 = 16, 4, 1
    x2 = jax.random.normal(k_x2, (N, inplanes2, Hs, Hs), jnp.float32)
    params2 = init_params(k_p2, inplanes2, planes2, stride2)
    out2 = jax.block_until_ready(fwd(x2, params2, stride2))
    ref2 = reference_forward(x2, params2, stride2)
    assert out2.shape == (N, planes2 * 4, Hs, Hs)
    assert jnp.allclose(out2, ref2, rtol=RTOL, atol=ATOL), "identity path mismatch"

    print("KERNEL_OK")
</pallas_src>

<mosaic_0001>
module attributes {stable_mosaic.version = 11 : i64} {
  func.func @kernel(%arg0: i32, %arg1: memref<1x16x16x128xf32, #tpu.memory_space<vmem>>, %arg2: memref<1x8x8x128xf32, #tpu.memory_space<vmem>>, %arg3: memref<128x128xbf16, #tpu.memory_space<vmem>>, %arg4: memref<1x128xf32, #tpu.memory_space<vmem>>, %arg5: memref<9x128x128xbf16, #tpu.memory_space<vmem>>, %arg6: memref<1x128xf32, #tpu.memory_space<vmem>>, %arg7: memref<128x128xbf16, #tpu.memory_space<vmem>>, %arg8: memref<1x128xf32, #tpu.memory_space<vmem>>, %arg9: memref<128x128xbf16, #tpu.memory_space<vmem>>, %arg10: memref<1x128xf32, #tpu.memory_space<vmem>>, %arg11: memref<1x8x8x128xf32, #tpu.memory_space<vmem>>, %arg12: memref<18x18x128xf32, #tpu.memory_space<vmem>>) attributes {dimension_semantics = [#tpu.dimension_semantics<parallel>], iteration_bounds = array<i64: 2>, scalar_prefetch = 0 : i64, scratch_operands = 1 : i64, tpu.core_type = #tpu.core_type<tc>, window_params = [{transform_indices = @transform_0, window_bounds = array<i64: 1, 16, 16, 128>}, {transform_indices = @transform_1, window_bounds = array<i64: 1, 8, 8, 128>}, {pipeline_mode = #tpu.pipeline_mode<synchronous>, transform_indices = @transform_2, window_bounds = array<i64: 128, 128>}, {pipeline_mode = #tpu.pipeline_mode<synchronous>, transform_indices = @transform_3, window_bounds = array<i64: 1, 128>}, {pipeline_mode = #tpu.pipeline_mode<synchronous>, transform_indices = @transform_4, window_bounds = array<i64: 9, 128, 128>}, {pipeline_mode = #tpu.pipeline_mode<synchronous>, transform_indices = @transform_5, window_bounds = array<i64: 1, 128>}, {pipeline_mode = #tpu.pipeline_mode<synchronous>, transform_indices = @transform_6, window_bounds = array<i64: 128, 128>}, {pipeline_mode = #tpu.pipeline_mode<synchronous>, transform_indices = @transform_7, window_bounds = array<i64: 1, 128>}, {pipeline_mode = #tpu.pipeline_mode<synchronous>, transform_indices = @transform_8, window_bounds = array<i64: 128, 128>}, {pipeline_mode = #tpu.pipeline_mode<synchronous>, transform_indices = @transform_9, window_bounds = array<i64: 1, 128>}, {transform_indices = @transform_10, window_bounds = array<i64: 1, 8, 8, 128>}]} {
    %cst = arith.constant 0.000000e+00 : f32
    %0 = vector.broadcast %cst : f32 to vector<18x18x128xf32>
    %c0 = arith.constant 0 : index
    %c0_0 = arith.constant 0 : index
    %c0_1 = arith.constant 0 : index
    %1 = vector.load %arg12[%c0, %c0_0, %c0_1] : memref<18x18x128xf32, #tpu.memory_space<vmem>>, vector<18x18x128xf32>
    tpu.vector_store %arg12[%c0, %c0_0, %c0_1], %0 {strides = array<i32>} : memref<18x18x128xf32, #tpu.memory_space<vmem>>, vector<18x18x128xf32>,
    %c0_2 = arith.constant 0 : index
    %c0_3 = arith.constant 0 : index
    %c0_4 = arith.constant 0 : index
    %c0_5 = arith.constant 0 : index
    %2 = vector.load %arg1[%c0_2, %c0_3, %c0_4, %c0_5] : memref<1x16x16x128xf32, #tpu.memory_space<vmem>>, vector<1x16x16x128xf32>
    %3 = vector.shape_cast %2 : vector<1x16x16x128xf32> to vector<16x16x128xf32>
    %4 = vector.shape_cast %3 : vector<16x16x128xf32> to vector<256x128xf32>
    %5 = arith.truncf %4 : vector<256x128xf32> to vector<256x128xbf16>
    %c0_6 = arith.constant 0 : index
    %c0_7 = arith.constant 0 : index
    %6 = vector.load %arg3[%c0_6, %c0_7] : memref<128x128xbf16, #tpu.memory_space<vmem>>, vector<128x128xbf16>
    %cst_8 = arith.constant dense<0.000000e+00> : vector<256x128xf32>
    %7 = tpu.matmul %5, %6, %cst_8 {dimension_numbers = #tpu.dot_dimension_numbers<[1], [0], [0], [1], [0, 0, 1, 1], [], []>} : vector<256x128xbf16>, vector<128x128xbf16>, vector<256x128xf32> -> vector<256x128xf32>
    %c0_9 = arith.constant 0 : index
    %c0_10 = arith.constant 0 : index
    %8 = vector.load %arg4[%c0_9, %c0_10] : memref<1x128xf32, #tpu.memory_space<vmem>>, vector<1x128xf32>
    %9 = vector.broadcast %8 : vector<1x128xf32> to vector<256x128xf32>
    %10 = arith.addf %7, %9 : vector<256x128xf32>
    %cst_11 = arith.constant 0.000000e+00 : f32
    %11 = vector.broadcast %cst_11 : f32 to vector<256x128xf32>
    %12 = arith.maximumf %10, %11 : vector<256x128xf32>
    %13 = vector.shape_cast %12 : vector<256x128xf32> to vector<16x16x128xf32>
    %c1 = arith.constant 1 : index
    %c1_12 = arith.constant 1 : index
    %c0_13 = arith.constant 0 : index
    %14 = vector.load %arg12[%c1, %c1_12, %c0_13] : memref<18x18x128xf32, #tpu.memory_space<vmem>>, vector<16x16x128xf32>
    tpu.vector_store %arg12[%c1, %c1_12, %c0_13], %13 {strides = array<i32>} : memref<18x18x128xf32, #tpu.memory_space<vmem>>, vector<16x16x128xf32>,
    %cst_14 = arith.constant 0.000000e+00 : f32
    %15 = vector.broadcast %cst_14 : f32 to vector<64x128xf32>
    %c0_15 = arith.constant 0 : index
    %c0_16 = arith.constant 0 : index
    %c0_17 = arith.constant 0 : index
    %16 = tpu.strided_load %arg12[%c0_15, %c0_16, %c0_17] {strides = array<i32: 2, 2, 1>} : memref<18x18x128xf32, #tpu.memory_space<vmem>>, vector<8x8x128xf32>
    %17 = vector.shape_cast %16 : vector<8x8x128xf32> to vector<64x128xf32>
    %18 = arith.truncf %17 : vector<64x128xf32> to vector<64x128xbf16>
    %c0_18 = arith.constant 0 : index
    %c0_19 = arith.constant 0 : index
    %c0_20 = arith.constant 0 : index
    %19 = vector.load %arg5[%c0_18, %c0_19, %c0_20] : memref<9x128x128xbf16, #tpu.memory_space<vmem>>, vector<1x128x128xbf16>
    %20 = vector.shape_cast %19 : vector<1x128x128xbf16> to vector<128x128xbf16>
    %cst_21 = arith.constant dense<0.000000e+00> : vector<64x128xf32>
    %21 = tpu.matmul %18, %20, %cst_21 {dimension_numbers = #tpu.dot_dimension_numbers<[1], [0], [0], [1], [0, 0, 1, 1], [], []>} : vector<64x128xbf16>, vector<128x128xbf16>, vector<64x128xf32> -> vector<64x128xf32>
    %22 = arith.addf %15, %21 : vector<64x128xf32>
    %c0_22 = arith.constant 0 : index
    %c1_23 = arith.constant 1 : index
    %c0_24 = arith.constant 0 : index
    %23 = tpu.strided_load %arg12[%c0_22, %c1_23, %c0_24] {strides = array<i32: 2, 2, 1>} : memref<18x18x128xf32, #tpu.memory_space<vmem>>, vector<8x8x128xf32>
    %24 = vector.shape_cast %23 : vector<8x8x128xf32> to vector<64x128xf32>
    %25 = arith.truncf %24 : vector<64x128xf32> to vector<64x128xbf16>
    %c1_25 = arith.constant 1 : index
    %c0_26 = arith.constant 0 : index
    %c0_27 = arith.constant 0 : index
    %26 = vector.load %arg5[%c1_25, %c0_26, %c0_27] : memref<9x128x128xbf16, #tpu.memory_space<vmem>>, vector<1x128x128xbf16>
    %27 = vector.shape_cast %26 : vector<1x128x128xbf16> to vector<128x128xbf16>
    %cst_28 = arith.constant dense<0.000000e+00> : vector<64x128xf32>
    %28 = tpu.matmul %25, %27, %cst_28 {dimension_numbers = #tpu.dot_dimension_numbers<[1], [0], [0], [1], [0, 0, 1, 1], [], []>} : vector<64x128xbf16>, vector<128x128xbf16>, vector<64x128xf32> -> vector<64x128xf32>
    %29 = arith.addf %22, %28 : vector<64x128xf32>
    %c0_29 = arith.constant 0 : index
    %c2 = arith.constant 2 : index
    %c0_30 = arith.constant 0 : index
    %30 = tpu.strided_load %arg12[%c0_29, %c2, %c0_30] {strides = array<i32: 2, 2, 1>} : memref<18x18x128xf32, #tpu.memory_space<vmem>>, vector<8x8x128xf32>
    %31 = vector.shape_cast %30 : vector<8x8x128xf32> to vector<64x128xf32>
    %32 = arith.truncf %31 : vector<64x128xf32> to vector<64x128xbf16>
    %c2_31 = arith.constant 2 : index
    %c0_32 = arith.constant 0 : index
    %c0_33 = arith.constant 0 : index
    %33 = vector.load %arg5[%c2_31, %c0_32, %c0_33] : memref<9x128x128xbf16, #tpu.memory_space<vmem>>, vector<1x128x128xbf16>
    %34 = vector.shape_cast %33 : vector<1x128x128xbf16> to vector<128x128xbf16>
    %cst_34 = arith.constant dense<0.000000e+00> : vector<64x128xf32>
    %35 = tpu.matmul %32, %34, %cst_34 {dimension_numbers = #tpu.dot_dimension_numbers<[1], [0], [0], [1], [0, 0, 1, 1], [], []>} : vector<64x128xbf16>, vector<128x128xbf16>, vector<64x128xf32> -> vector<64x128xf32>
    %36 = arith.addf %29, %35 : vector<64x128xf32>
    %c1_35 = arith.constant 1 : index
    %c0_36 = arith.constant 0 : index
    %c0_37 = arith.constant 0 : index
    %37 = tpu.strided_load %arg12[%c1_35, %c0_36, %c0_37] {strides = array<i32: 2, 2, 1>} : memref<18x18x128xf32, #tpu.memory_space<vmem>>, vector<8x8x128xf32>
    %38 = vector.shape_cast %37 : vector<8x8x128xf32> to vector<64x128xf32>
    %39 = arith.truncf %38 : vector<64x128xf32> to vector<64x128xbf16>
    %c3 = arith.constant 3 : index
    %c0_38 = arith.constant 0 : index
    %c0_39 = arith.constant 0 : index
    %40 = vector.load %arg5[%c3, %c0_38, %c0_39] : memref<9x128x128xbf16, #tpu.memory_space<vmem>>, vector<1x128x128xbf16>
    %41 = vector.shape_cast %40 : vector<1x128x128xbf16> to vector<128x128xbf16>
    %cst_40 = arith.constant dense<0.000000e+00> : vector<64x128xf32>
    %42 = tpu.matmul %39, %41, %cst_40 {dimension_numbers = #tpu.dot_dimension_numbers<[1], [0], [0], [1], [0, 0, 1, 1], [], []>} : vector<64x128xbf16>, vector<128x128xbf16>, vector<64x128xf32> -> vector<64x128xf32>
    %43 = arith.addf %36, %42 : vector<64x128xf32>
    %c1_41 = arith.constant 1 : index
    %c1_42 = arith.constant 1 : index
    %c0_43 = arith.constant 0 : index
    %44 = tpu.strided_load %arg12[%c1_41, %c1_42, %c0_43] {strides = array<i32: 2, 2, 1>} : memref<18x18x128xf32, #tpu.memory_space<vmem>>, vector<8x8x128xf32>
    %45 = vector.shape_cast %44 : vector<8x8x128xf32> to vector<64x128xf32>
    %46 = arith.truncf %45 : vector<64x128xf32> to vector<64x128xbf16>
    %c4 = arith.constant 4 : index
    %c0_44 = arith.constant 0 : index
    %c0_45 = arith.constant 0 : index
    %47 = vector.load %arg5[%c4, %c0_44, %c0_45] : memref<9x128x128xbf16, #tpu.memory_space<vmem>>, vector<1x128x128xbf16>
    %48 = vector.shape_cast %47 : vector<1x128x128xbf16> to vector<128x128xbf16>
    %cst_46 = arith.constant dense<0.000000e+00> : vector<64x128xf32>
    %49 = tpu.matmul %46, %48, %cst_46 {dimension_numbers = #tpu.dot_dimension_numbers<[1], [0], [0], [1], [0, 0, 1, 1], [], []>} : vector<64x128xbf16>, vector<128x128xbf16>, vector<64x128xf32> -> vector<64x128xf32>
    %50 = arith.addf %43, %49 : vector<64x128xf32>
    %c1_47 = arith.constant 1 : index
    %c2_48 = arith.constant 2 : index
    %c0_49 = arith.constant 0 : index
    %51 = tpu.strided_load %arg12[%c1_47, %c2_48, %c0_49] {strides = array<i32: 2, 2, 1>} : memref<18x18x128xf32, #tpu.memory_space<vmem>>, vector<8x8x128xf32>
    %52 = vector.shape_cast %51 : vector<8x8x128xf32> to vector<64x128xf32>
    %53 = arith.truncf %52 : vector<64x128xf32> to vector<64x128xbf16>
    %c5 = arith.constant 5 : index
    %c0_50 = arith.constant 0 : index
    %c0_51 = arith.constant 0 : index
    %54 = vector.load %arg5[%c5, %c0_50, %c0_51] : memref<9x128x128xbf16, #tpu.memory_space<vmem>>, vector<1x128x128xbf16>
    %55 = vector.shape_cast %54 : vector<1x128x128xbf16> to vector<128x128xbf16>
    %cst_52 = arith.constant dense<0.000000e+00> : vector<64x128xf32>
    %56 = tpu.matmul %53, %55, %cst_52 {dimension_numbers = #tpu.dot_dimension_numbers<[1], [0], [0], [1], [0, 0, 1, 1], [], []>} : vector<64x128xbf16>, vector<128x128xbf16>, vector<64x128xf32> -> vector<64x128xf32>
    %57 = arith.addf %50, %56 : vector<64x128xf32>
    %c2_53 = arith.constant 2 : index
    %c0_54 = arith.constant 0 : index
    %c0_55 = arith.constant 0 : index
    %58 = tpu.strided_load %arg12[%c2_53, %c0_54, %c0_55] {strides = array<i32: 2, 2, 1>} : memref<18x18x128xf32, #tpu.memory_space<vmem>>, vector<8x8x128xf32>
    %59 = vector.shape_cast %58 : vector<8x8x128xf32> to vector<64x128xf32>
    %60 = arith.truncf %59 : vector<64x128xf32> to vector<64x128xbf16>
    %c6 = arith.constant 6 : index
    %c0_56 = arith.constant 0 : index
    %c0_57 = arith.constant 0 : index
    %61 = vector.load %arg5[%c6, %c0_56, %c0_57] : memref<9x128x128xbf16, #tpu.memory_space<vmem>>, vector<1x128x128xbf16>
    %62 = vector.shape_cast %61 : vector<1x128x128xbf16> to vector<128x128xbf16>
    %cst_58 = arith.constant dense<0.000000e+00> : vector<64x128xf32>
    %63 = tpu.matmul %60, %62, %cst_58 {dimension_numbers = #tpu.dot_dimension_numbers<[1], [0], [0], [1], [0, 0, 1, 1], [], []>} : vector<64x128xbf16>, vector<128x128xbf16>, vector<64x128xf32> -> vector<64x128xf32>
    %64 = arith.addf %57, %63 : vector<64x128xf32>
    %c2_59 = arith.constant 2 : index
    %c1_60 = arith.constant 1 : index
    %c0_61 = arith.constant 0 : index
    %65 = tpu.strided_load %arg12[%c2_59, %c1_60, %c0_61] {strides = array<i32: 2, 2, 1>} : memref<18x18x128xf32, #tpu.memory_space<vmem>>, vector<8x8x128xf32>
    %66 = vector.shape_cast %65 : vector<8x8x128xf32> to vector<64x128xf32>
    %67 = arith.truncf %66 : vector<64x128xf32> to vector<64x128xbf16>
    %c7 = arith.constant 7 : index
    %c0_62 = arith.constant 0 : index
    %c0_63 = arith.constant 0 : index
    %68 = vector.load %arg5[%c7, %c0_62, %c0_63] : memref<9x128x128xbf16, #tpu.memory_space<vmem>>, vector<1x128x128xbf16>
    %69 = vector.shape_cast %68 : vector<1x128x128xbf16> to vector<128x128xbf16>
    %cst_64 = arith.constant dense<0.000000e+00> : vector<64x128xf32>
    %70 = tpu.matmul %67, %69, %cst_64 {dimension_numbers = #tpu.dot_dimension_numbers<[1], [0], [0], [1], [0, 0, 1, 1], [], []>} : vector<64x128xbf16>, vector<128x128xbf16>, vector<64x128xf32> -> vector<64x128xf32>
    %71 = arith.addf %64, %70 : vector<64x128xf32>
    %c2_65 = arith.constant 2 : index
    %c2_66 = arith.constant 2 : index
    %c0_67 = arith.constant 0 : index
    %72 = tpu.strided_load %arg12[%c2_65, %c2_66, %c0_67] {strides = array<i32: 2, 2, 1>} : memref<18x18x128xf32, #tpu.memory_space<vmem>>, vector<8x8x128xf32>
    %73 = vector.shape_cast %72 : vector<8x8x128xf32> to vector<64x128xf32>
    %74 = arith.truncf %73 : vector<64x128xf32> to vector<64x128xbf16>
    %c8 = arith.constant 8 : index
    %c0_68 = arith.constant 0 : index
    %c0_69 = arith.constant 0 : index
    %75 = vector.load %arg5[%c8, %c0_68, %c0_69] : memref<9x128x128xbf16, #tpu.memory_space<vmem>>, vector<1x128x128xbf16>
    %76 = vector.shape_cast %75 : vector<1x128x128xbf16> to vector<128x128xbf16>
    %cst_70 = arith.constant dense<0.000000e+00> : vector<64x128xf32>
    %77 = tpu.matmul %74, %76, %cst_70 {dimension_numbers = #tpu.dot_dimension_numbers<[1], [0], [0], [1], [0, 0, 1, 1], [], []>} : vector<64x128xbf16>, vector<128x128xbf16>, vector<64x128xf32> -> vector<64x128xf32>
    %78 = arith.addf %71, %77 : vector<64x128xf32>
    %c0_71 = arith.constant 0 : index
    %c0_72 = arith.constant 0 : index
    %79 = vector.load %arg6[%c0_71, %c0_72] : memref<1x128xf32, #tpu.memory_space<vmem>>, vector<1x128xf32>
    %80 = vector.broadcast %79 : vector<1x128xf32> to vector<64x128xf32>
    %81 = arith.addf %78, %80 : vector<64x128xf32>
    %cst_73 = arith.constant 0.000000e+00 : f32
    %82 = vector.broadcast %cst_73 : f32 to vector<64x128xf32>
    %83 = arith.maximumf %81, %82 : vector<64x128xf32>
    %84 = arith.truncf %83 : vector<64x128xf32> to vector<64x128xbf16>
    %c0_74 = arith.constant 0 : index
    %c0_75 = arith.constant 0 : index
    %85 = vector.load %arg7[%c0_74, %c0_75] : memref<128x128xbf16, #tpu.memory_space<vmem>>, vector<128x128xbf16>
    %cst_76 = arith.constant dense<0.000000e+00> : vector<64x128xf32>
    %86 = tpu.matmul %84, %85, %cst_76 {dimension_numbers = #tpu.dot_dimension_numbers<[1], [0], [0], [1], [0, 0, 1, 1], [], []>} : vector<64x128xbf16>, vector<128x128xbf16>, vector<64x128xf32> -> vector<64x128xf32>
    %c0_77 = arith.constant 0 : index
    %c0_78 = arith.constant 0 : index
    %87 = vector.load %arg8[%c0_77, %c0_78] : memref<1x128xf32, #tpu.memory_space<vmem>>, vector<1x128xf32>
    %88 = vector.broadcast %87 : vector<1x128xf32> to vector<64x128xf32>
    %89 = arith.addf %86, %88 : vector<64x128xf32>
    %c0_79 = arith.constant 0 : index
    %c0_80 = arith.constant 0 : index
    %c0_81 = arith.constant 0 : index
    %c0_82 = arith.constant 0 : index
    %90 = vector.load %arg2[%c0_79, %c0_80, %c0_81, %c0_82] : memref<1x8x8x128xf32, #tpu.memory_space<vmem>>, vector<1x8x8x128xf32>
    %91 = vector.shape_cast %90 : vector<1x8x8x128xf32> to vector<8x8x128xf32>
    %92 = vector.shape_cast %91 : vector<8x8x128xf32> to vector<64x128xf32>
    %93 = arith.truncf %92 : vector<64x128xf32> to vector<64x128xbf16>
    %c0_83 = arith.constant 0 : index
    %c0_84 = arith.constant 0 : index
    %94 = vector.load %arg9[%c0_83, %c0_84] : memref<128x128xbf16, #tpu.memory_space<vmem>>, vector<128x128xbf16>
    %cst_85 = arith.constant dense<0.000000e+00> : vector<64x128xf32>
    %95 = tpu.matmul %93, %94, %cst_85 {dimension_numbers = #tpu.dot_dimension_numbers<[1], [0], [0], [1], [0, 0, 1, 1], [], []>} : vector<64x128xbf16>, vector<128x128xbf16>, vector<64x128xf32> -> vector<64x128xf32>
    %c0_86 = arith.constant 0 : index
    %c0_87 = arith.constant 0 : index
    %96 = vector.load %arg10[%c0_86, %c0_87] : memref<1x128xf32, #tpu.memory_space<vmem>>, vector<1x128xf32>
    %97 = vector.broadcast %96 : vector<1x128xf32> to vector<64x128xf32>
    %98 = arith.addf %95, %97 : vector<64x128xf32>
    %99 = arith.addf %89, %98 : vector<64x128xf32>
    %cst_88 = arith.constant 0.000000e+00 : f32
    %100 = vector.broadcast %cst_88 : f32 to vector<64x128xf32>
    %101 = arith.maximumf %99, %100 : vector<64x128xf32>
    %102 = vector.shape_cast %101 : vector<64x128xf32> to vector<8x8x128xf32>
    %c0_89 = arith.constant 0 : index
    %c0_90 = arith.constant 0 : index
    %c0_91 = arith.constant 0 : index
    %c0_92 = arith.constant 0 : index
    %103 = vector.load %arg11[%c0_89, %c0_90, %c0_91, %c0_92] : memref<1x8x8x128xf32, #tpu.memory_space<vmem>>, vector<1x8x8x128xf32>
    %104 = vector.shape_cast %103 : vector<1x8x8x128xf32> to vector<8x8x128xf32>
    %105 = vector.shape_cast %102 : vector<8x8x128xf32> to vector<1x8x8x128xf32>
    tpu.vector_store %arg11[%c0_89, %c0_90, %c0_91, %c0_92], %105 {strides = array<i32>} : memref<1x8x8x128xf32, #tpu.memory_space<vmem>>, vector<1x8x8x128xf32>,
    return
  }
  func.func @transform_0(%arg0: i32) -> (i32, i32, i32, i32) {
    %c0_i32 = arith.constant 0 : i32
    %c0_i32_0 = arith.constant 0 : i32
    %c0_i32_1 = arith.constant 0 : i32
    %c0_i32_2 = arith.constant 0 : i32
    return %arg0, %c0_i32, %c0_i32_0, %c0_i32_1 : i32, i32, i32, i32
  }
  func.func @transform_1(%arg0: i32) -> (i32, i32, i32, i32) {
    %c0_i32 = arith.constant 0 : i32
    %c0_i32_0 = arith.constant 0 : i32
    %c0_i32_1 = arith.constant 0 : i32
    %c0_i32_2 = arith.constant 0 : i32
    return %arg0, %c0_i32, %c0_i32_0, %c0_i32_1 : i32, i32, i32, i32
  }
  func.func @transform_2(%arg0: i32) -> (i32, i32) {
    %c0_i32 = arith.constant 0 : i32
    %c0_i32_0 = arith.constant 0 : i32
    %c0_i32_1 = arith.constant 0 : i32
    return %c0_i32, %c0_i32_0 : i32, i32
  }
  func.func @transform_3(%arg0: i32) -> (i32, i32) {
    %c0_i32 = arith.constant 0 : i32
    %c0_i32_0 = arith.constant 0 : i32
    %c0_i32_1 = arith.constant 0 : i32
    return %c0_i32, %c0_i32_0 : i32, i32
  }
  func.func @transform_4(%arg0: i32) -> (i32, i32, i32) {
    %c0_i32 = arith.constant 0 : i32
    %c0_i32_0 = arith.constant 0 : i32
    %c0_i32_1 = arith.constant 0 : i32
    %c0_i32_2 = arith.constant 0 : i32
    return %c0_i32, %c0_i32_0, %c0_i32_1 : i32, i32, i32
  }
  func.func @transform_5(%arg0: i32) -> (i32, i32) {
    %c0_i32 = arith.constant 0 : i32
    %c0_i32_0 = arith.constant 0 : i32
    %c0_i32_1 = arith.constant 0 : i32
    return %c0_i32, %c0_i32_0 : i32, i32
  }
  func.func @transform_6(%arg0: i32) -> (i32, i32) {
    %c0_i32 = arith.constant 0 : i32
    %c0_i32_0 = arith.constant 0 : i32
    %c0_i32_1 = arith.constant 0 : i32
    return %c0_i32, %c0_i32_0 : i32, i32
  }
  func.func @transform_7(%arg0: i32) -> (i32, i32) {
    %c0_i32 = arith.constant 0 : i32
    %c0_i32_0 = arith.constant 0 : i32
    %c0_i32_1 = arith.constant 0 : i32
    return %c0_i32, %c0_i32_0 : i32, i32
  }
  func.func @transform_8(%arg0: i32) -> (i32, i32) {
    %c0_i32 = arith.constant 0 : i32
    %c0_i32_0 = arith.constant 0 : i32
    %c0_i32_1 = arith.constant 0 : i32
    return %c0_i32, %c0_i32_0 : i32, i32
  }
  func.func @transform_9(%arg0: i32) -> (i32, i32) {
    %c0_i32 = arith.constant 0 : i32
    %c0_i32_0 = arith.constant 0 : i32
    %c0_i32_1 = arith.constant 0 : i32
    return %c0_i32, %c0_i32_0 : i32, i32
  }
  func.func @transform_10(%arg0: i32) -> (i32, i32, i32, i32) {
    %c0_i32 = arith.constant 0 : i32
    %c0_i32_0 = arith.constant 0 : i32
    %c0_i32_1 = arith.constant 0 : i32
    %c0_i32_2 = arith.constant 0 : i32
    return %arg0, %c0_i32, %c0_i32_0, %c0_i32_1 : i32, i32, i32, i32
  }
}

</mosaic_0001>

<bundles_post_ra>
// kernel: bottle2neck_forward.1
= control target key start
LH: loop header
LB: loop body
LE: loop exit
PB: predicated region body
PF: predicated region fallthrough
CT: control target
= control target key end

     0   :  { %s2851_s13 = smov 0   ;;  %s3421_s0 = inlined_call_operand.vmem [shape: f32[2,16,16,128], index: 0, kind: input, shape index: {}]   ;;  %s3422_s1 = inlined_call_operand.vmem [shape: f32[2,8,8,128], index: 1, kind: input, shape index: {}]   ;;  %s3423_s2 = inlined_call_operand.vmem [shape: bf16[128,128], index: 2, kind: input, shape index: {}]   ;;  %s3424_s3 = inlined_call_operand.vmem [shape: f32[1,128], index: 3, kind: input, shape index: {}]   ;;  %s3425_s4 = inlined_call_operand.vmem [shape: bf16[9,128,128], index: 4, kind: input, shape index: {}]   ;;  %s3426_s5 = inlined_call_operand.vmem [shape: f32[1,128], index: 5, kind: input, shape index: {}]   ;;  %s3427_s6 = inlined_call_operand.vmem [shape: bf16[128,128], index: 6, kind: input, shape index: {}]   ;;  %s3428_s7 = inlined_call_operand.vmem [shape: f32[1,128], index: 7, kind: input, shape index: {}]   ;;  %s3429_s8 = inlined_call_operand.vmem [shape: bf16[128,128], index: 8, kind: input, shape index: {}]   ;;  %s3430_s9 = inlined_call_operand.vmem [shape: f32[1,128], index: 9, kind: input, shape index: {}]   ;;  %s3431_s10 = inlined_call_operand.vmem [shape: f32[2,8,8,128], index: 10, kind: output, shape index: {}]  }
   0x1 LB: > { %s2150_s14 = sadd.s32 4294967295, %s2793_s13   ;;  %p2154_p0 = scmp.ge.s32.totalorder %s2793_s13, 1  ;;  %s2793_s13 = sphi %s2851_s13, %s20_s13  }
   0x2   : > { %p322_p1 = scmp.lt.s32.totalorder %s2793_s13, 3 }
   0x4   : > { %p323_p2 = pnand %p2154_p0, %p322_p1 }
   0x5   : > { %p365_p3 = scmp.lt.s32.totalorder (!%p323_p2), %s2150_s14, 1 }
   0x6   : > { %326 = sbr.rel (%p323_p2) target bundleno = 818 (0x332), region = 60 }
   0xb   : > { %v2685_v0 = vld [vmem:[%s3423_s2 + $0x38] sm:$0xff]  ;;  %v2684_v1 = vld [vmem:[%s3423_s2 + $0x30] sm:$0xff]  ;;  %v2683_v2 = vld [vmem:[%s3423_s2 + $0x28] sm:$0xff]  ;;  %s3433_s14 = smov (!%p365_p3, %s2150_s14), 1  ;;  %v2795_v26 = vmov 0.0  }
   0xc   : > { %550 = vmatpush.bf16.msra.mxu0 %v2685_v0  ;;  %v2682_v3 = vld [vmem:[%s3423_s2 + $0x20] sm:$0xff]  ;;  %v2681_v4 = vld [vmem:[%s3423_s2 + $0x18] sm:$0xff]  ;;  %v2680_v5 = vld [vmem:[%s3423_s2 + $0x10] sm:$0xff]  ;;  %s2675_s27 = sshll.u32 %s3433_s14, 8  ;;  %383 = vst [vmem:[#allocation2 + $0x18] sm:$0xff] %v2795_v26  ;;  %s2676_s29 = sshll.u32 %s3433_s14, 6 }
   0xd   : > { %v2679_v6 = vld [vmem:[%s3423_s2 + $0x8] sm:$0xff]  ;;  %s2886_s12 = scalar_lea.vmem %s3421_s0, %s2675_s27  ;;  %v2678_v7 = vld [vmem:[%s3423_s2] sm:$0xff]  ;;  %384 = vst [vmem:[#allocation2 + $0x20] sm:$0xff] %v2795_v26  ;;  %v2701_v30 = vld [vmem:[%s3425_s4 + $0x78] sm:$0xff]  ;;  %s3321_s15 = scalar_lea.vmem %s3422_s1, %s2676_s29 }
   0xe   : > { %v434_v8 = vld [vmem:[%s2886_s12] sm:$0xff]  ;;  %v435_v9 = vld [vmem:[%s2886_s12 + $0x8] sm:$0xff]  ;;  %v436_v11 = vld [vmem:[%s2886_s12 + $0x10] sm:$0xff]  ;;  %380 = vst [vmem:[#allocation2] sm:$0xff] %v2795_v26  ;;  %824 = vmatpush.bf16.msra.mxu1 %v2701_v30  ;;  %s3408_s30 = scalar_lea.vmem %s3431_s10, %s2676_s29 }
   0xf   : > { %v466_v10 = vpack.c.bf16 %v435_v9, %v434_v8  ;;  %v437_v12 = vld [vmem:[%s2886_s12 + $0x18] sm:$0xff]  ;;  %v438_v14 = vld [vmem:[%s2886_s12 + $0x20] sm:$0xff]  ;;  %v439_v15 = vld [vmem:[%s2886_s12 + $0x28] sm:$0xff]  ;;  %381 = vst [vmem:[#allocation2 + $0x8] sm:$0xff] %v2795_v26 }
  0x10   : > { %551 = vmatpush.bf16.msra.mxu0 %v2684_v1  ;;  %v467_v13 = vpack.c.bf16 %v437_v12, %v436_v11  ;;  %v468_v16 = vpack.c.bf16 %v439_v15, %v438_v14  ;;  %v440_v17 = vld [vmem:[%s2886_s12 + $0x30] sm:$0xff]  ;;  %v441_v18 = vld [vmem:[%s2886_s12 + $0x38] sm:$0xff]  ;;  %v442_v20 = vld [vmem:[%s2886_s12 + $0x40] sm:$0xff]  ;;  %382 = vst [vmem:[#allocation2 + $0x10] sm:$0x3] %v2795_v26 }
  0x11   : > { %v469_v19 = vpack.c.bf16 %v441_v18, %v440_v17  ;;  %v443_v21 = vld [vmem:[%s2886_s12 + $0x48] sm:$0xff]  ;;  %v444_v23 = vld [vmem:[%s2886_s12 + $0x50] sm:$0xff]  ;;  %v445_v24 = vld [vmem:[%s2886_s12 + $0x58] sm:$0xff]  ;;  %385 = vst [vmem:[#allocation2 + $0x28] sm:$0x3] %v2795_v26 }
  0x12   : > { %v470_v22 = vpack.c.bf16 %v443_v21, %v442_v20  ;;  %v471_v25 = vpack.c.bf16 %v445_v24, %v444_v23  ;;  %v446_v27 = vld [vmem:[%s2886_s12 + $0x60] sm:$0xff]  ;;  %v447_v28 = vld [vmem:[%s2886_s12 + $0x68] sm:$0xff]  ;;  %386 = vst [vmem:[#allocation2 + $0x30] sm:$0xff] %v2795_v26  ;;  %v2693_v31 = vld [vmem:[%s3425_s4 + $0x38] sm:$0xff] }
  0x13   : > { %387 = vst [vmem:[#allocation2 + $0x38] sm:$0xff] %v2795_v26  ;;  %v472_v29 = vpack.c.bf16 %v447_v28, %v446_v27  ;;  %v2709_v32 = vld [vmem:[%s3425_s4 + $0xb8] sm:$0xff]  ;;  %901 = vmatpush.bf16.msra.mxu2 %v2693_v31  ;;  %v2700_v33 = vld [vmem:[%s3425_s4 + $0x70] sm:$0xff]  ;;  %v2699_v38 = vld [vmem:[%s3425_s4 + $0x68] sm:$0xff] }
  0x14   : > { %552 = vmatpush.bf16.msra.mxu0 %v2683_v2  ;;  %388 = vst [vmem:[#allocation2 + $0x40] sm:$0x3] %v2795_v26  ;;  %1015 = vmatpush.bf16.msra.mxu3 %v2709_v32  ;;  %v2692_v34 = vld [vmem:[%s3425_s4 + $0x30] sm:$0xff]  ;;  %v449_v37 = vld [vmem:[%s2886_s12 + $0x78] sm:$0xff]  ;;  %v2691_v39 = vld [vmem:[%s3425_s4 + $0x28] sm:$0xff] }
  0x15   : > { %389 = vst [vmem:[#allocation2 + $0x48] sm:$0xff] %v2795_v26  ;;  %v2708_v35 = vld [vmem:[%s3425_s4 + $0xb0] sm:$0xff]  ;;  %825 = vmatpush.bf16.msra.mxu1 %v2700_v33  ;;  %v2707_v40 = vld [vmem:[%s3425_s4 + $0xa8] sm:$0xff]  ;;  %v2698_v42 = vld [vmem:[%s3425_s4 + $0x60] sm:$0xff] }
  0x16   : > { %390 = vst [vmem:[#allocation2 + $0x50] sm:$0xff] %v2795_v26  ;;  %v448_v36 = vld [vmem:[%s2886_s12 + $0x70] sm:$0xff]  ;;  %v2690_v43 = vld [vmem:[%s3425_s4 + $0x20] sm:$0xff]  ;;  %v2697_v45 = vld [vmem:[%s3425_s4 + $0x58] sm:$0xff] }
  0x17   : > { %391 = vst [vmem:[#allocation2 + $0x58] sm:$0x3] %v2795_v26  ;;  %902 = vmatpush.bf16.msra.mxu2 %v2692_v34  ;;  %v473_v41 = vpack.c.bf16 %v449_v37, %v448_v36  ;;  %v2706_v44 = vld [vmem:[%s3425_s4 + $0xa0] sm:$0xff]  ;;  %v2689_v46 = vld [vmem:[%s3425_s4 + $0x18] sm:$0xff]  ;;  %v2696_v48 = vld [vmem:[%s3425_s4 + $0x50] sm:$0xff] }
  0x18   : > { %553 = vmatpush.bf16.msra.mxu0 %v2682_v3  ;;  %392 = vst [vmem:[#allocation2 + $0x60] sm:$0xff] %v2795_v26  ;;  %1016 = vmatpush.bf16.msra.mxu3 %v2708_v35  ;;  %v2705_v47 = vld [vmem:[%s3425_s4 + $0x98] sm:$0xff]  ;;  %v2688_v49 = vld [vmem:[%s3425_s4 + $0x10] sm:$0xff]  ;;  %v450_v51 = vld [vmem:[%s2886_s12 + $0x80] sm:$0xff] }
  0x19   : > { %393 = vst [vmem:[#allocation2 + $0x68] sm:$0xff] %v2795_v26  ;;  %826 = vmatpush.bf16.msra.mxu1 %v2699_v38  ;;  %v2704_v50 = vld [vmem:[%s3425_s4 + $0x90] sm:$0xff]  ;;  %v451_v52 = vld [vmem:[%s2886_s12 + $0x88] sm:$0xff]  ;;  %v3004_v53 = vld [vmem:[%s3424_s3] ss:$0 sm:$0xff] }
  0x1a   : > { %394 = vst [vmem:[#allocation2 + $0x70] sm:$0x3] %v2795_v26  ;;  %v2695_v54 = vld [vmem:[%s3425_s4 + $0x48] sm:$0xff]  ;;  %v474_v57 = vpack.c.bf16 %v451_v52, %v450_v51  ;;  %v2694_v60 = vld [vmem:[%s3425_s4 + $0x40] sm:$0xff]  ;;  %v452_v3 = vld [vmem:[%s2886_s12 + $0x90] sm:$0xff] }
  0x1b   : > { %395 = vst [vmem:[#allocation2 + $0x78] sm:$0xff] %v2795_v26  ;;  %903 = vmatpush.bf16.msra.mxu2 %v2691_v39  ;;  %v2687_v55 = vld [vmem:[%s3425_s4 + $0x8] sm:$0xff]  ;;  %v2686_v61 = vld [vmem:[%s3425_s4] sm:$0xff]  ;;  %v456_v30 = vld [vmem:[%s2886_s12 + $0xb0] sm:$0xff] }
  0x1c   : > { %554 = vmatpush.bf16.msra.mxu0 %v2681_v4  ;;  %396 = vst [vmem:[#allocation2 + $0x80] sm:$0xff] %v2795_v26  ;;  %1017 = vmatpush.bf16.msra.mxu3 %v2707_v40  ;;  %v2703_v56 = vld [vmem:[%s3425_s4 + $0x88] sm:$0xff]  ;;  %v2702_v62 = vld [vmem:[%s3425_s4 + $0x80] sm:$0xff]  ;;  %v453_v4 = vld [vmem:[%s2886_s12 + $0x98] sm:$0xff] }
  0x1d   : > { %397 = vst [vmem:[#allocation2 + $0x88] sm:$0x3] %v2795_v26  ;;  %827 = vmatpush.bf16.msra.mxu1 %v2698_v42  ;;  %v454_v12 = vld [vmem:[%s2886_s12 + $0xa0] sm:$0xff]  ;;  %v457_v31 = vld [vmem:[%s2886_s12 + $0xb8] sm:$0xff]  ;;  %v459_v40 = vld [vmem:[%s2886_s12 + $0xc8] sm:$0xff] }
  0x1e   : > { %398 = vst [vmem:[#allocation2 + $0x90] sm:$0xff] %v2795_v26  ;;  %v740_v17 = vld [vmem:[#allocation2 + $0x1] ss:$2 sm:$0xff]  ;;  %v704_v18 = vld [vmem:[#allocation2] ss:$2 sm:$0xff]  ;;  %v477_v32 = vpack.c.bf16 %v457_v31, %v456_v30  ;;  %v2725_v30 = vld [vmem:[%s3425_s4 + $0x138] sm:$0xff] }
  0x1f   : > { %399 = vst [vmem:[#allocation2 + $0x98] sm:$0xff] %v2795_v26  ;;  %904 = vmatpush.bf16.msra.mxu2 %v2690_v43  ;;  %v458_v39 = vld [vmem:[%s2886_s12 + $0xc0] sm:$0xff] }
  0x20   : > { %555 = vmatpush.bf16.msra.mxu0 %v2680_v5  ;;  %400 = vst [vmem:[#allocation2 + $0xa0] sm:$0x3] %v2795_v26  ;;  %1018 = vmatpush.bf16.msra.mxu3 %v2706_v44  ;;  %v475_v5 = vpack.c.bf16 %v453_v4, %v452_v3 }
  0x21   : > { %401 = vst [vmem:[#allocation2 + $0xa8] sm:$0xff] %v2795_v26  ;;  %828 = vmatpush.bf16.msra.mxu1 %v2697_v45 }
  0x22   : > { %402 = vst [vmem:[#allocation2 + $0xb0] sm:$0xff] %v2795_v26 }
  0x23   : > { %403 = vst [vmem:[#allocation2 + $0xb8] sm:$0x3] %v2795_v26  ;;  %905 = vmatpush.bf16.msra.mxu2 %v2689_v46 }
  0x24   : > { %556 = vmatpush.bf16.msra.mxu0 %v2679_v6  ;;  %404 = vst [vmem:[#allocation2 + $0xc0] sm:$0xff] %v2795_v26  ;;  %1019 = vmatpush.bf16.msra.mxu3 %v2705_v47 }
  0x25   : > { %405 = vst [vmem:[#allocation2 + $0xc8] sm:$0xff] %v2795_v26  ;;  %829 = vmatpush.bf16.msra.mxu1 %v2696_v48  ;;  %v460_v48 = vld [vmem:[%s2886_s12 + $0xd0] sm:$0xff] }
  0x26   : > { %406 = vst [vmem:[#allocation2 + $0xd0] sm:$0x3] %v2795_v26 }
  0x27   : > { %407 = vst [vmem:[#allocation2 + $0xd8] sm:$0xff] %v2795_v26  ;;  %906 = vmatpush.bf16.msra.mxu2 %v2688_v49  ;;  %v461_v49 = vld [vmem:[%s2886_s12 + $0xd8] sm:$0xff] }
  0x28   : > { %557 = vmatpush.bf16.msra.mxu0 %v2678_v7  ;;  %408 = vst [vmem:[#allocation2 + $0xe0] sm:$0xff] %v2795_v26  ;;  %1020 = vmatpush.bf16.msra.mxu3 %v2704_v50  ;;  %v479_v50 = vpack.c.bf16 %v461_v49, %v460_v48  ;;  %v2732_v49 = vld [vmem:[%s3425_s4 + $0x170] sm:$0xff] }
  0x29   : > { %409 = vst [vmem:[#allocation2 + $0xe8] sm:$0x3] %v2795_v26  ;;  %830 = vmatpush.bf16.msra.mxu1 %v2695_v54 }
  0x2a   : > { %410 = vst [vmem:[#allocation2 + $0xf0] sm:$0xff] %v2795_v26 }
  0x2b   : > { %558 = vmatmul.bf16.vlgmr.msra.gmra.mxu0 %v466_v10  ;;  %411 = vst [vmem:[#allocation2 + $0xf8] sm:$0xff] %v2795_v26  ;;  %907 = vmatpush.bf16.msra.mxu2 %v2687_v55 }
  0x2c   : > { %412 = vst [vmem:[#allocation2 + $0x100] sm:$0x3] %v2795_v26  ;;  %1021 = vmatpush.bf16.msra.mxu3 %v2703_v56 }
  0x2d   : > { %413 = vst [vmem:[#allocation2 + $0x108] sm:$0xff] %v2795_v26  ;;  %831 = vmatpush.bf16.msra.mxu1 %v2694_v60 }
  0x2e   : > { %414 = vst [vmem:[#allocation2 + $0x110] sm:$0xff] %v2795_v26 }
  0x2f   : > { %415 = vst [vmem:[#allocation2 + $0x118] sm:$0x3] %v2795_v26  ;;  %908 = vmatpush.bf16.msra.mxu2 %v2686_v61 }
  0x30   : > { %416 = vst [vmem:[#allocation2 + $0x120] sm:$0xff] %v2795_v26  ;;  %1022 = vmatpush.bf16.msra.mxu3 %v2702_v62 }
  0x31   : > { %417 = vst [vmem:[#allocation2 + $0x128] sm:$0xff] %v2795_v26 }
  0x32   : > { %418 = vst [vmem:[#allocation2 + $0x130] sm:$0x3] %v2795_v26 }
  0x33   : > { %419 = vst [vmem:[#allocation2 + $0x138] sm:$0xff] %v2795_v26  ;;  %1258 = vmatpush.bf16.msrb.mxu2 %v2725_v30  ;;  %v2749_v30 = vld [vmem:[%s3425_s4 + $0x1f8] sm:$0xff] }
  0x34   : > { %420 = vst [vmem:[#allocation2 + $0x140] sm:$0xff] %v2795_v26 }
  0x35   : > { %421 = vst [vmem:[#allocation2 + $0x148] sm:$0x3] %v2795_v26 }
  0x36   : > { %422 = vst [vmem:[#allocation2 + $0x150] sm:$0xff] %v2795_v26 }
  0x37   : > { %423 = vst [vmem:[#allocation2 + $0x158] sm:$0xff] %v2795_v26 }
  0x38   : > { %424 = vst [vmem:[#allocation2 + $0x160] sm:$0x3] %v2795_v26 }
  0x39   : > { %425 = vst [vmem:[#allocation2 + $0x168] sm:$0xff] %v2795_v26 }
  0x3a   : > { %426 = vst [vmem:[#allocation2 + $0x170] sm:$0xff] %v2795_v26 }
  0x3b   : > { %563 = vmatmul.bf16.gmra.mxu0 %v467_v13  ;;  %427 = vst [vmem:[#allocation2 + $0x178] sm:$0x3] %v2795_v26  ;;  %v455_v13 = vld [vmem:[%s2886_s12 + $0xa8] sm:$0xff] }
  0x3c   : > { %428 = vst [vmem:[#allocation2 + $0x180] sm:$0xff] %v2795_v26  ;;  %v476_v14 = vpack.c.bf16 %v455_v13, %v454_v12  ;;  %v464_v12 = vld [vmem:[%s2886_s12 + $0xf0] sm:$0xff]  ;;  %v465_v13 = vld [vmem:[%s2886_s12 + $0xf8] sm:$0xff] }
  0x3d   : > { %429 = vst [vmem:[#allocation2 + $0x188] sm:$0xff] %v2795_v26 }
  0x3e   : > { %430 = vst [vmem:[#allocation2 + $0x190] sm:$0x3] %v2795_v26 }
  0x4b   : > { %568 = vmatmul.bf16.gmra.mxu0 %v468_v16 }
  0x5b   : > { %573 = vmatmul.bf16.gmra.mxu0 %v469_v19  ;;  %v931_v19 = vld [vmem:[#allocation2 + $0x2] ss:$2 sm:$0xff] }
  0x6b   : > { %578 = vmatmul.bf16.gmra.mxu0 %v470_v22 }
  0x7b   : > { %583 = vmatmul.bf16.gmra.mxu0 %v471_v25 }
  0x8b   : > { %588 = vmatmul.bf16.gmra.mxu0 %v472_v29 }
  0x9b   : > { %593 = vmatmul.bf16.gmra.mxu0 %v473_v41  ;;  %v478_v41 = vpack.c.bf16 %v459_v40, %v458_v39 }
  0xa8   : > { %v559_v58 = vpop.f32.mrf.mxu0 }
  0xa9   : > { %v560_v59 = vadd.f32 %v3004_v53, %v559_v58  ;;  %v462_v58 = vld [vmem:[%s2886_s12 + $0xe0] sm:$0xff] }
  0xab   : > { %v639_v63 = vmax.f32 %v560_v59, 0.0  ;;  %598 = vmatmul.bf16.gmra.mxu0 %v474_v57  ;;  %v463_v59 = vld [vmem:[%s2886_s12 + $0xe8] sm:$0xff] }
  0xac   : > { %v480_v60 = vpack.c.bf16 %v463_v59, %v462_v58 }
  0xad   : > { %672 = vst [vmem:[#allocation2 + $0x19] sm:$0xff] %v639_v63 }
  0xb0   : > { %v561_v0 = vpop.f32.mrf.mxu0 }
  0xb1   : > { %v562_v1 = vadd.f32 %v3004_v53, %v561_v0 }
  0xb3   : > { %v640_v2 = vmax.f32 %v562_v1, 0.0 }
  0xb5   : > { %673 = vst [vmem:[#allocation2 + $0x21] sm:$0xff] %v640_v2 }
  0xb8   : > { %v564_v6 = vpop.f32.mrf.mxu0 }
  0xb9   : > { %v565_v7 = vadd.f32 %v3004_v53, %v564_v6 }
  0xbb   : > { %v641_v8 = vmax.f32 %v565_v7, 0.0  ;;  %603 = vmatmul.bf16.gmra.mxu0 %v475_v5 }
  0xbd   : > { %674 = vst [vmem:[#allocation2 + $0x31] sm:$0xff] %v641_v8 }
  0xc0   : > { %v566_v9 = vpop.f32.mrf.mxu0 }
  0xc1   : > { %v567_v10 = vadd.f32 %v3004_v53, %v566_v9 }
  0xc3   : > { %v642_v11 = vmax.f32 %v567_v10, 0.0 }
  0xc5   : > { %675 = vst [vmem:[#allocation2 + $0x39] sm:$0xff] %v642_v11 }
  0xc8   : > { %v569_v15 = vpop.f32.mrf.mxu0 }
  0xc9   : > { %v570_v16 = vadd.f32 %v3004_v53, %v569_v15 }
  0xcb   : > { %v643_v20 = vmax.f32 %v570_v16, 0.0  ;;  %608 = vmatmul.bf16.gmra.mxu0 %v476_v14  ;;  %v481_v14 = vpack.c.bf16 %v465_v13, %v464_v12 }
  0xcc   : > { %v742_v21 = vld [vmem:[#allocation2 + $0x31] ss:$2 sm:$0xff]  ;;  %v706_v22 = vld [vmem:[#allocation2 + $0x30] ss:$2 sm:$0xff] }
  0xcd   : > { %v933_v23 = vld [vmem:[#allocation2 + $0x32] ss:$2 sm:$0xff]  ;;  %676 = vst [vmem:[#allocation2 + $0x49] sm:$0xff] %v643_v20  ;;  %v755_v24 = vpack.c.bf16 %v742_v21, %v740_v17  ;;  %v719_v25 = vpack.c.bf16 %v706_v22, %v704_v18 }
  0xce   : > { %v946_v26 = vpack.c.bf16 %v933_v23, %v931_v19 }
  0xcf   : > { %832 = vmatmul.bf16.vlgmr.msra.gmra.mxu1 %v755_v24  ;;  %909 = vmatmul.bf16.vlgmr.msra.gmra.mxu2 %v719_v25 }
  0xd0   : > { %1023 = vmatmul.bf16.vlgmr.msra.gmra.mxu3 %v946_v26  ;;  %v571_v27 = vpop.f32.mrf.mxu0 }
  0xd1   : > { %v572_v28 = vadd.f32 %v3004_v53, %v571_v27 }
  0xd3   : > { %v644_v29 = vmax.f32 %v572_v28, 0.0 }
  0xd5   : > { %677 = vst [vmem:[#allocation2 + $0x51] sm:$0xff] %v644_v29 }
  0xd8   : > { %v574_v33 = vpop.f32.mrf.mxu0 }
  0xd9   : > { %v575_v34 = vadd.f32 %v3004_v53, %v574_v33 }
  0xdb   : > { %v645_v35 = vmax.f32 %v575_v34, 0.0  ;;  %613 = vmatmul.bf16.gmra.mxu0 %v477_v32  ;;  %v2733_v34 = vld [vmem:[%s3425_s4 + $0x178] sm:$0xff] }
  0xdc   : > { %1380 = vmatpush.bf16.msrb.mxu3 %v2733_v34  ;;  %v2741_v34 = vld [vmem:[%s3425_s4 + $0x1b8] sm:$0xff] }
  0xdd   : > { %678 = vst [vmem:[#allocation2 + $0x61] sm:$0xff] %v645_v35  ;;  %v2717_v35 = vld [vmem:[%s3425_s4 + $0xf8] sm:$0xff] }
  0xde   : > { %1136 = vmatpush.bf16.msrb.mxu1 %v2717_v35  ;;  %v2748_v35 = vld [vmem:[%s3425_s4 + $0x1f0] sm:$0xff] }
  0xe0   : > { %v576_v36 = vpop.f32.mrf.mxu0  ;;  %1381 = vmatpush.bf16.msrb.mxu3 %v2732_v49 }
  0xe1   : > { %v577_v37 = vadd.f32 %v3004_v53, %v576_v36  ;;  %v2724_v36 = vld [vmem:[%s3425_s4 + $0x130] sm:$0xff] }
  0xe2   : > { %1259 = vmatpush.bf16.msrb.mxu2 %v2724_v36  ;;  %v2756_v36 = vld [vmem:[%s3425_s4 + $0x230] sm:$0xff] }
  0xe3   : > { %v646_v38 = vmax.f32 %v577_v37, 0.0 }
  0xe5   : > { %679 = vst [vmem:[#allocation2 + $0x69] sm:$0xff] %v646_v38 }
  0xe8   : > { %v579_v42 = vpop.f32.mrf.mxu0 }
  0xe9   : > { %v580_v43 = vadd.f32 %v3004_v53, %v579_v42 }
  0xeb   : > { %v647_v44 = vmax.f32 %v580_v43, 0.0  ;;  %618 = vmatmul.bf16.gmra.mxu0 %v478_v41 }
  0xec   : > { %v744_v63 = vld [vmem:[#allocation2 + $0x61] ss:$2 sm:$0xff]  ;;  %v708_v1 = vld [vmem:[#allocation2 + $0x60] ss:$2 sm:$0xff] }
  0xed   : > { %680 = vst [vmem:[#allocation2 + $0x79] sm:$0xff] %v647_v44  ;;  %v935_v2 = vld [vmem:[#allocation2 + $0x62] ss:$2 sm:$0xff] }
  0xf0   : > { %v581_v45 = vpop.f32.mrf.mxu0 }
  0xf1   : > { %v582_v46 = vadd.f32 %v3004_v53, %v581_v45 }
  0xf3   : > { %v648_v47 = vmax.f32 %v582_v46, 0.0 }
  0xf5   : > { %681 = vst [vmem:[#allocation2 + $0x81] sm:$0xff] %v648_v47 }
  0xf8   : > { %v584_v51 = vpop.f32.mrf.mxu0 }
  0xf9   : > { %v585_v52 = vadd.f32 %v3004_v53, %v584_v51  ;;  %v2723_v51 = vld [vmem:[%s3425_s4 + $0x128] sm:$0xff] }
  0xfa   : > { %1260 = vmatpush.bf16.msrb.mxu2 %v2723_v51 }
  0xfb   : > { %v649_v54 = vmax.f32 %v585_v52, 0.0  ;;  %623 = vmatmul.bf16.gmra.mxu0 %v479_v50  ;;  %v2716_v50 = vld [vmem:[%s3425_s4 + $0xf0] sm:$0xff] }
  0xfc   : > { %1137 = vmatpush.bf16.msrb.mxu1 %v2716_v50 }
  0xfd   : > { %682 = vst [vmem:[#allocation2 + $0x91] sm:$0xff] %v649_v54 }
 0x100   : > { %v586_v55 = vpop.f32.mrf.mxu0 }
 0x101   : > { %v587_v56 = vadd.f32 %v3004_v53, %v586_v55 }
 0x103   : > { %v650_v57 = vmax.f32 %v587_v56, 0.0 }
 0x105   : > { %683 = vst [vmem:[#allocation2 + $0x99] sm:$0xff] %v650_v57 }
 0x108   : > { %v589_v61 = vpop.f32.mrf.mxu0 }
 0x109   : > { %v590_v62 = vadd.f32 %v3004_v53, %v589_v61  ;;  %v2731_v61 = vld [vmem:[%s3425_s4 + $0x168] sm:$0xff] }
 0x10a   : > { %1382 = vmatpush.bf16.msrb.mxu3 %v2731_v61 }
 0x10b   : > { %v651_v0 = vmax.f32 %v590_v62, 0.0  ;;  %628 = vmatmul.bf16.gmra.mxu0 %v480_v60  ;;  %v2715_v62 = vld [vmem:[%s3425_s4 + $0xe8] sm:$0xff] }
 0x10c   : > { %v746_v3 = vld [vmem:[#allocation2 + $0x91] ss:$2 sm:$0xff]  ;;  %v710_v4 = vld [vmem:[#allocation2 + $0x90] ss:$2 sm:$0xff]  ;;  %1138 = vmatpush.bf16.msrb.mxu1 %v2715_v62  ;;  %v2746_v62 = vld [vmem:[%s3425_s4 + $0x1e0] sm:$0xff] }
 0x10d   : > { %v937_v5 = vld [vmem:[#allocation2 + $0x92] ss:$2 sm:$0xff]  ;;  %684 = vst [vmem:[#allocation2 + $0xa9] sm:$0xff] %v651_v0  ;;  %v756_v6 = vpack.c.bf16 %v746_v3, %v744_v63  ;;  %v720_v7 = vpack.c.bf16 %v710_v4, %v708_v1 }
 0x10e   : > { %v947_v8 = vpack.c.bf16 %v937_v5, %v935_v2  ;;  %v2722_v63 = vld [vmem:[%s3425_s4 + $0x120] sm:$0xff]  ;;  %v2721_v5 = vld [vmem:[%s3425_s4 + $0x118] sm:$0xff] }
 0x10f   : > { %837 = vmatmul.bf16.gmra.mxu1 %v756_v6  ;;  %914 = vmatmul.bf16.gmra.mxu2 %v720_v7  ;;  %v2730_v3 = vld [vmem:[%s3425_s4 + $0x160] sm:$0xff] }
 0x110   : > { %1028 = vmatmul.bf16.gmra.mxu3 %v947_v8  ;;  %v591_v9 = vpop.f32.mrf.mxu0  ;;  %1261 = vmatpush.bf16.msrb.mxu2 %v2722_v63  ;;  %v2714_v4 = vld [vmem:[%s3425_s4 + $0xe0] sm:$0xff] }
 0x111   : > { %v592_v10 = vadd.f32 %v3004_v53, %v591_v9  ;;  %1383 = vmatpush.bf16.msrb.mxu3 %v2730_v3  ;;  %1139 = vmatpush.bf16.msrb.mxu1 %v2714_v4  ;;  %v2729_v9 = vld [vmem:[%s3425_s4 + $0x158] sm:$0xff]  ;;  %v2754_v63 = vld [vmem:[%s3425_s4 + $0x220] sm:$0xff] }
 0x113   : > { %v652_v11 = vmax.f32 %v592_v10, 0.0  ;;  %v2713_v10 = vld [vmem:[%s3425_s4 + $0xd8] sm:$0xff] }
 0x114   : > { %1262 = vmatpush.bf16.msrb.mxu2 %v2721_v5 }
 0x115   : > { %685 = vst [vmem:[#allocation2 + $0xb1] sm:$0xff] %v652_v11  ;;  %v2720_v11 = vld [vmem:[%s3425_s4 + $0x110] sm:$0xff]  ;;  %1384 = vmatpush.bf16.msrb.mxu3 %v2729_v9  ;;  %1140 = vmatpush.bf16.msrb.mxu1 %v2713_v10 }
 0x116   : > { %v1298_v10 = vld [vmem:[#allocation2 + $0x4a] ss:$2 sm:$0xff] }
 0x118   : > { %v594_v15 = vpop.f32.mrf.mxu0  ;;  %1263 = vmatpush.bf16.msrb.mxu2 %v2720_v11  ;;  %v1052_v11 = vld [vmem:[#allocation2 + $0x18] ss:$2 sm:$0xff] }
 0x119   : > { %v595_v16 = vadd.f32 %v3004_v53, %v594_v15  ;;  %v2728_v15 = vld [vmem:[%s3425_s4 + $0x150] sm:$0xff] }
 0x11a   : > { %1385 = vmatpush.bf16.msrb.mxu3 %v2728_v15  ;;  %v1296_v15 = vld [vmem:[#allocation2 + $0x1a] ss:$2 sm:$0xff] }
 0x11b   : > { %v653_v17 = vmax.f32 %v595_v16, 0.0  ;;  %633 = vmatmul.bf16.gmra.mxu0 %v481_v14  ;;  %v2712_v16 = vld [vmem:[%s3425_s4 + $0xd0] sm:$0xff] }
 0x11c   : > { %1141 = vmatpush.bf16.msrb.mxu1 %v2712_v16  ;;  %v1311_v16 = vpack.c.bf16 %v1298_v10, %v1296_v15  ;;  %v1664_v10 = vld [vmem:[#allocation2 + $0x62] ss:$2 sm:$0xff]  ;;  %v1662_v15 = vld [vmem:[#allocation2 + $0x32] ss:$2 sm:$0xff] }
 0x11d   : > { %686 = vst [vmem:[#allocation2 + $0xc1] sm:$0xff] %v653_v17 }
 0x120   : > { %v596_v18 = vpop.f32.mrf.mxu0 }
 0x121   : > { %v597_v19 = vadd.f32 %v3004_v53, %v596_v18  ;;  %v2719_v18 = vld [vmem:[%s3425_s4 + $0x108] sm:$0xff] }
 0x122   : > { %1264 = vmatpush.bf16.msrb.mxu2 %v2719_v18  ;;  %v2745_v18 = vld [vmem:[%s3425_s4 + $0x1d8] sm:$0xff] }
 0x123   : > { %v654_v20 = vmax.f32 %v597_v19, 0.0 }
 0x125   : > { %687 = vst [vmem:[#allocation2 + $0xc9] sm:$0xff] %v654_v20 }
 0x128   : > { %v599_v21 = vpop.f32.mrf.mxu0 }
 0x129   : > { %v600_v22 = vadd.f32 %v3004_v53, %v599_v21  ;;  %v2727_v21 = vld [vmem:[%s3425_s4 + $0x148] sm:$0xff] }
 0x12a   : > { %1386 = vmatpush.bf16.msrb.mxu3 %v2727_v21 }
 0x12b   : > { %v655_v23 = vmax.f32 %v600_v22, 0.0  ;;  %v2711_v22 = vld [vmem:[%s3425_s4 + $0xc8] sm:$0xff] }
 0x12c   : > { %v748_v39 = vld [vmem:[#allocation2 + $0xc1] ss:$2 sm:$0xff]  ;;  %v712_v41 = vld [vmem:[#allocation2 + $0xc0] ss:$2 sm:$0xff]  ;;  %1142 = vmatpush.bf16.msrb.mxu1 %v2711_v22  ;;  %v2744_v22 = vld [vmem:[%s3425_s4 + $0x1d0] sm:$0xff] }
 0x12d   : > { %688 = vst [vmem:[#allocation2 + $0xd9] sm:$0xff] %v655_v23  ;;  %v939_v42 = vld [vmem:[#allocation2 + $0xc2] ss:$2 sm:$0xff] }
 0x12e   : > { %v2718_v23 = vld [vmem:[%s3425_s4 + $0x100] sm:$0xff] }
 0x12f   : > { %1265 = vmatpush.bf16.msrb.mxu2 %v2718_v23  ;;  %v2752_v23 = vld [vmem:[%s3425_s4 + $0x210] sm:$0xff] }
 0x130   : > { %v601_v24 = vpop.f32.mrf.mxu0 }
 0x131   : > { %v602_v25 = vadd.f32 %v3004_v53, %v601_v24 }
 0x133   : > { %v656_v26 = vmax.f32 %v602_v25, 0.0  ;;  %1624 = vmatpush.bf16.msra.mxu2 %v2749_v30 }
 0x135   : > { %689 = vst [vmem:[#allocation2 + $0xe1] sm:$0xff] %v656_v26 }
 0x137   : > { %1625 = vmatpush.bf16.msra.mxu2 %v2748_v35  ;;  %v2751_v35 = vld [vmem:[%s3425_s4 + $0x208] sm:$0xff] }
 0x138   : > { %v604_v27 = vpop.f32.mrf.mxu0 }
 0x139   : > { %v605_v28 = vadd.f32 %v3004_v53, %v604_v27  ;;  %v2726_v27 = vld [vmem:[%s3425_s4 + $0x140] sm:$0xff] }
 0x13a   : > { %1387 = vmatpush.bf16.msrb.mxu3 %v2726_v27  ;;  %v1302_v27 = vld [vmem:[#allocation2 + $0xaa] ss:$2 sm:$0xff] }
 0x13b   : > { %v657_v29 = vmax.f32 %v605_v28, 0.0  ;;  %v2710_v28 = vld [vmem:[%s3425_s4 + $0xc0] sm:$0xff] }
 0x13c   : > { %1143 = vmatpush.bf16.msrb.mxu1 %v2710_v28  ;;  %v1056_v28 = vld [vmem:[#allocation2 + $0x78] ss:$2 sm:$0xff] }
 0x13d   : > { %690 = vst [vmem:[#allocation2 + $0xf1] sm:$0xff] %v657_v29 }
 0x140   : > { %v606_v31 = vpop.f32.mrf.mxu0  ;;  %1502 = vmatpush.bf16.msra.mxu1 %v2741_v34  ;;  %v2743_v34 = vld [vmem:[%s3425_s4 + $0x1c8] sm:$0xff] }
 0x141   : > { %v607_v32 = vadd.f32 %v3004_v53, %v606_v31 }
 0x143   : > { %v658_v33 = vmax.f32 %v607_v32, 0.0 }
 0x145   : > { %691 = vst [vmem:[#allocation2 + $0xf9] sm:$0xff] %v658_v33  ;;  %v2757_v33 = vld [vmem:[%s3425_s4 + $0x238] sm:$0xff] }
 0x146   : > { %1746 = vmatpush.bf16.msra.mxu3 %v2757_v33 }
 0x148   : > { %v609_v37 = vpop.f32.mrf.mxu0 }
 0x149   : > { %v610_v38 = vadd.f32 %v3004_v53, %v609_v37  ;;  %v2740_v37 = vld [vmem:[%s3425_s4 + $0x1b0] sm:$0xff] }
 0x14a   : > { %1747 = vmatpush.bf16.msra.mxu3 %v2756_v36  ;;  %1503 = vmatpush.bf16.msra.mxu1 %v2740_v37  ;;  %v2735_v36 = vld [vmem:[%s3425_s4 + $0x188] sm:$0xff]  ;;  %v2742_v37 = vld [vmem:[%s3425_s4 + $0x1c0] sm:$0xff] }
 0x14b   : > { %v659_v40 = vmax.f32 %v610_v38, 0.0 }
 0x14c   : > { %v750_v43 = vld [vmem:[#allocation2 + $0xf1] ss:$2 sm:$0xff]  ;;  %v714_v44 = vld [vmem:[#allocation2 + $0xf0] ss:$2 sm:$0xff]  ;;  %v833_v55 = vpop.f32.mrf.mxu1 }
 0x14d   : > { %v941_v45 = vld [vmem:[#allocation2 + $0xf2] ss:$2 sm:$0xff]  ;;  %692 = vst [vmem:[#allocation2 + $0x109] sm:$0xff] %v659_v40  ;;  %v757_v46 = vpack.c.bf16 %v750_v43, %v748_v39  ;;  %v721_v47 = vpack.c.bf16 %v714_v44, %v712_v41 }
 0x14e   : > { %v948_v48 = vpack.c.bf16 %v941_v45, %v939_v42 }
 0x14f   : > { %842 = vmatmul.bf16.gmra.mxu1 %v757_v46  ;;  %919 = vmatmul.bf16.gmra.mxu2 %v721_v47 }
 0x150   : > { %1033 = vmatmul.bf16.gmra.mxu3 %v948_v48  ;;  %v611_v52 = vpop.f32.mrf.mxu0 }
 0x151   : > { %v612_v54 = vadd.f32 %v3004_v53, %v611_v52 }
 0x152   : > { %v910_v56 = vpop.f32.mrf.mxu2 }
 0x153   : > { %v660_v57 = vmax.f32 %v612_v54, 0.0  ;;  %v911_v58 = vadd.f32 %v910_v56, %v833_v55  ;;  %v1024_v59 = vpop.f32.mrf.mxu3  ;;  %v2747_v55 = vld [vmem:[%s3425_s4 + $0x1e8] sm:$0xff] }
 0x154   : > { %v3172_v40 = vpop.f32.mrf.mxu1  ;;  %v2755_v56 = vld [vmem:[%s3425_s4 + $0x228] sm:$0xff]  ;;  %1626 = vmatpush.bf16.msra.mxu2 %v2747_v55 }
 0x155   : > { %693 = vst [vmem:[#allocation2 + $0x111] sm:$0xff] %v660_v57  ;;  %v3094_v60 = vadd.f32 %v1024_v59, %v911_v58  ;;  %v2739_v57 = vld [vmem:[%s3425_s4 + $0x1a8] sm:$0xff]  ;;  %1748 = vmatpush.bf16.msra.mxu3 %v2755_v56 }
 0x156   : > { %1504 = vmatpush.bf16.msra.mxu1 %v2739_v57 }
 0x158   : > { %v614_v0 = vpop.f32.mrf.mxu0  ;;  %1627 = vmatpush.bf16.msra.mxu2 %v2746_v62 }
 0x159   : > { %v615_v1 = vadd.f32 %v3004_v53, %v614_v0  ;;  %1749 = vmatpush.bf16.msra.mxu3 %v2754_v63 }
 0x15a   : > { %v3174_v41 = vpop.f32.mrf.mxu2 }
 0x15b   : > { %v661_v2 = vmax.f32 %v615_v1, 0.0  ;;  %v3176_v46 = vpop.f32.mrf.mxu3 }
 0x15c   : > { %1628 = vmatpush.bf16.msra.mxu2 %v2745_v18  ;;  %v1546_v18 = vld [vmem:[#allocation2 + $0xc1] ss:$2 sm:$0xff] }
 0x15d   : > { %694 = vst [vmem:[#allocation2 + $0x121] sm:$0xff] %v661_v2  ;;  %v2738_v2 = vld [vmem:[%s3425_s4 + $0x1a0] sm:$0xff] }
 0x15e   : > { %1505 = vmatpush.bf16.msra.mxu1 %v2738_v2 }
 0x160   : > { %v616_v6 = vpop.f32.mrf.mxu0  ;;  %1629 = vmatpush.bf16.msra.mxu2 %v2744_v22 }
 0x161   : > { %v617_v7 = vadd.f32 %v3004_v53, %v616_v6 }
 0x163   : > { %v662_v8 = vmax.f32 %v617_v7, 0.0  ;;  %v1054_v7 = vld [vmem:[#allocation2 + $0x48] ss:$2 sm:$0xff] }
 0x164   : > { %1630 = vmatpush.bf16.msra.mxu2 %v2743_v34 }
 0x165   : > { %695 = vst [vmem:[#allocation2 + $0x129] sm:$0xff] %v662_v8  ;;  %v1176_v8 = vld [vmem:[#allocation2 + $0x49] ss:$2 sm:$0xff] }
 0x168   : > { %v619_v12 = vpop.f32.mrf.mxu0  ;;  %1631 = vmatpush.bf16.msra.mxu2 %v2742_v37 }
 0x169   : > { %v620_v13 = vadd.f32 %v3004_v53, %v619_v12  ;;  %v1174_v12 = vld [vmem:[#allocation2 + $0x19] ss:$2 sm:$0xff] }
 0x16b   : > { %v663_v14 = vmax.f32 %v620_v13, 0.0  ;;  %v1067_v13 = vpack.c.bf16 %v1054_v7, %v1052_v11  ;;  %v1418_v11 = vld [vmem:[#allocation2 + $0x30] ss:$2 sm:$0xff] }
 0x16c   : > { %v752_v42 = vld [vmem:[#allocation2 + $0x121] ss:$2 sm:$0xff]  ;;  %v716_v44 = vld [vmem:[#allocation2 + $0x120] ss:$2 sm:$0xff] }
 0x16d   : > { %696 = vst [vmem:[#allocation2 + $0x139] sm:$0xff] %v663_v14  ;;  %v943_v45 = vld [vmem:[#allocation2 + $0x122] ss:$2 sm:$0xff]  ;;  %v1189_v14 = vpack.c.bf16 %v1176_v8, %v1174_v12  ;;  %v1540_v12 = vld [vmem:[#allocation2 + $0x31] ss:$2 sm:$0xff] }
 0x16e   : > { %v1420_v8 = vld [vmem:[#allocation2 + $0x60] ss:$2 sm:$0xff] }
 0x170   : > { %v621_v17 = vpop.f32.mrf.mxu0 }
 0x171   : > { %v622_v19 = vadd.f32 %v3004_v53, %v621_v17 }
 0x173   : > { %v664_v20 = vmax.f32 %v622_v19, 0.0  ;;  %v2753_v19 = vld [vmem:[%s3425_s4 + $0x218] sm:$0xff] }
 0x174   : > { %1750 = vmatpush.bf16.msra.mxu3 %v2753_v19  ;;  %v1668_v19 = vld [vmem:[#allocation2 + $0xc2] ss:$2 sm:$0xff] }
 0x175   : > { %697 = vst [vmem:[#allocation2 + $0x141] sm:$0xff] %v664_v20  ;;  %v2737_v20 = vld [vmem:[%s3425_s4 + $0x198] sm:$0xff] }
 0x176   : > { %1506 = vmatpush.bf16.msra.mxu1 %v2737_v20  ;;  %v1422_v20 = vld [vmem:[#allocation2 + $0x90] ss:$2 sm:$0xff] }
 0x178   : > { %v624_v24 = vpop.f32.mrf.mxu0  ;;  %1751 = vmatpush.bf16.msra.mxu3 %v2752_v23 }
 0x179   : > { %v625_v25 = vadd.f32 %v3004_v53, %v624_v24 }
 0x17b   : > { %v665_v26 = vmax.f32 %v625_v25, 0.0  ;;  %v2736_v25 = vld [vmem:[%s3425_s4 + $0x190] sm:$0xff] }
 0x17c   : > { %1507 = vmatpush.bf16.msra.mxu1 %v2736_v25  ;;  %1752 = vmatpush.bf16.msra.mxu3 %v2751_v35 }
 0x17d   : > { %698 = vst [vmem:[#allocation2 + $0x151] sm:$0xff] %v665_v26  ;;  %v1180_v26 = vld [vmem:[#allocation2 + $0xa9] ss:$2 sm:$0xff] }
 0x180   : > { %v626_v29 = vpop.f32.mrf.mxu0  ;;  %1508 = vmatpush.bf16.msra.mxu1 %v2735_v36 }
 0x181   : > { %v627_v31 = vadd.f32 %v3004_v53, %v626_v29  ;;  %v1178_v29 = vld [vmem:[#allocation2 + $0x79] ss:$2 sm:$0xff] }
 0x183   : > { %v666_v32 = vmax.f32 %v627_v31, 0.0  ;;  %v1190_v31 = vpack.c.bf16 %v1180_v26, %v1178_v29  ;;  %v1550_v26 = vld [vmem:[#allocation2 + $0x121] ss:$2 sm:$0xff]  ;;  %v1548_v29 = vld [vmem:[#allocation2 + $0xf1] ss:$2 sm:$0xff] }
 0x185   : > { %699 = vst [vmem:[#allocation2 + $0x159] sm:$0xff] %v666_v32  ;;  %v1300_v32 = vld [vmem:[#allocation2 + $0x7a] ss:$2 sm:$0xff] }
 0x186   : > { %v1312_v33 = vpack.c.bf16 %v1302_v27, %v1300_v32  ;;  %v1672_v27 = vld [vmem:[#allocation2 + $0x122] ss:$2 sm:$0xff]  ;;  %v1670_v32 = vld [vmem:[#allocation2 + $0xf2] ss:$2 sm:$0xff] }
 0x188   : > { %v629_v38 = vpop.f32.mrf.mxu0 }
 0x189   : > { %v630_v39 = vadd.f32 %v3004_v53, %v629_v38  ;;  %v2750_v38 = vld [vmem:[%s3425_s4 + $0x200] sm:$0xff] }
 0x18a   : > { %1753 = vmatpush.bf16.msra.mxu3 %v2750_v38 }
 0x18b   : > { %v667_v43 = vmax.f32 %v630_v39, 0.0  ;;  %v1062_v39 = vld [vmem:[#allocation2 + $0x108] ss:$2 sm:$0xff] }
 0x18c   : > { %v754_v47 = vld [vmem:[#allocation2 + $0x151] ss:$2 sm:$0xff]  ;;  %v718_v48 = vld [vmem:[#allocation2 + $0x150] ss:$2 sm:$0xff]  ;;  %v838_v59 = vpop.f32.mrf.mxu1 }
 0x18d   : > { %v945_v49 = vld [vmem:[#allocation2 + $0x152] ss:$2 sm:$0xff]  ;;  %700 = vst [vmem:[#allocation2 + $0x169] sm:$0xff] %v667_v43  ;;  %v758_v50 = vpack.c.bf16 %v754_v47, %v752_v42  ;;  %v722_v51 = vpack.c.bf16 %v718_v48, %v716_v44  ;;  %v1184_v42 = vld [vmem:[#allocation2 + $0x109] ss:$2 sm:$0xff] }
 0x18e   : > { %v949_v52 = vpack.c.bf16 %v945_v49, %v943_v45  ;;  %v1306_v43 = vld [vmem:[#allocation2 + $0x10a] ss:$2 sm:$0xff]  ;;  %v2734_v44 = vld [vmem:[%s3425_s4 + $0x180] sm:$0xff] }
 0x18f   : > { %847 = vmatmul.bf16.gmra.mxu1 %v758_v50  ;;  %924 = vmatmul.bf16.gmra.mxu2 %v722_v51  ;;  %v1060_v45 = vld [vmem:[#allocation2 + $0xd8] ss:$2 sm:$0xff]  ;;  %v1182_v47 = vld [vmem:[#allocation2 + $0xd9] ss:$2 sm:$0xff] }
 0x190   : > { %1038 = vmatmul.bf16.gmra.mxu3 %v949_v52  ;;  %v631_v54 = vpop.f32.mrf.mxu0  ;;  %v1069_v48 = vpack.c.bf16 %v1062_v39, %v1060_v45  ;;  %v1191_v49 = vpack.c.bf16 %v1184_v42, %v1182_v47  ;;  %v1304_v50 = vld [vmem:[#allocation2 + $0xda] ss:$2 sm:$0xff]  ;;  %1509 = vmatpush.bf16.msra.mxu1 %v2734_v44  ;;  %v1552_v44 = vld [vmem:[#allocation2 + $0x151] ss:$2 sm:$0xff] }
 0x191   : > { %v632_v58 = vadd.f32 %v3004_v53, %v631_v54  ;;  %v1313_v51 = vpack.c.bf16 %v1306_v43, %v1304_v50  ;;  %v1430_v43 = vld [vmem:[#allocation2 + $0x150] ss:$2 sm:$0xff] }
 0x192   : > { %v915_v61 = vpop.f32.mrf.mxu2 }
 0x193   : > { %v668_v0 = vmax.f32 %v632_v58, 0.0  ;;  %v916_v1 = vadd.f32 %v915_v61, %v838_v59  ;;  %v1029_v3 = vpop.f32.mrf.mxu3  ;;  %v1064_v59 = vld [vmem:[#allocation2 + $0x138] ss:$2 sm:$0xff]  ;;  %v1186_v61 = vld [vmem:[#allocation2 + $0x139] ss:$2 sm:$0xff] }
 0x194   : > { %v3237_v52 = vpop.f32.mrf.mxu1 }
 0x195   : > { %701 = vst [vmem:[#allocation2 + $0x171] sm:$0xff] %v668_v0  ;;  %v3197_v4 = vadd.f32 %v1029_v3, %v916_v1  ;;  %v1308_v0 = vld [vmem:[#allocation2 + $0x13a] ss:$2 sm:$0xff] }
 0x198   : > { %v634_v5 = vpop.f32.mrf.mxu0 }
 0x199   : > { %v635_v6 = vadd.f32 %v3004_v53, %v634_v5 }
 0x19a   : > { %v3239_v54 = vpop.f32.mrf.mxu2 }
 0x19b   : > { %v669_v9 = vmax.f32 %v635_v6, 0.0  ;;  %v3241_v58 = vpop.f32.mrf.mxu3 }
 0x19c   : > { %v1066_v55 = vld [vmem:[#allocation2 + $0x168] ss:$2 sm:$0xff]  ;;  %v1188_v56 = vld [vmem:[#allocation2 + $0x169] ss:$2 sm:$0xff] }
 0x19d   : > { %702 = vst [vmem:[#allocation2 + $0x181] sm:$0xff] %v669_v9  ;;  %v1310_v57 = vld [vmem:[#allocation2 + $0x16a] ss:$2 sm:$0xff]  ;;  %v1070_v62 = vpack.c.bf16 %v1066_v55, %v1064_v59  ;;  %v1192_v63 = vpack.c.bf16 %v1188_v56, %v1186_v61  ;;  %v1542_v9 = vld [vmem:[#allocation2 + $0x61] ss:$2 sm:$0xff] }
 0x19e   : > { %v1314_v1 = vpack.c.bf16 %v1310_v57, %v1308_v0  ;;  %v2765_v61 = vld [vmem:[%s3427_s6 + $0x38] sm:$0xff] }
 0x19f   : > { %1144 = vmatmul.bf16.vlgmr.msrb.gmra.mxu1 %v1067_v13  ;;  %1266 = vmatmul.bf16.vlgmr.msrb.gmra.mxu2 %v1189_v14  ;;  %v1433_v13 = vpack.c.bf16 %v1420_v8, %v1418_v11  ;;  %v1555_v14 = vpack.c.bf16 %v1542_v9, %v1540_v12  ;;  %v2770_v12 = vld [vmem:[%s3429_s8 + $0x20] sm:$0xff] }
 0x1a0   : > { %1388 = vmatmul.bf16.vlgmr.msrb.gmra.mxu3 %v1311_v16  ;;  %v636_v17 = vpop.f32.mrf.mxu0  ;;  %v1677_v16 = vpack.c.bf16 %v1664_v10, %v1662_v15  ;;  %1875 = vmatpush.bf16.msrb.mxu1 %v2765_v61 }
 0x1a1   : > { %v637_v21 = vadd.f32 %v3004_v53, %v636_v17  ;;  %v1058_v53 = vld [vmem:[#allocation2 + $0xa8] ss:$2 sm:$0xff] }
 0x1a2   : > { %v1068_v30 = vpack.c.bf16 %v1058_v53, %v1056_v28  ;;  %v1424_v17 = vld [vmem:[#allocation2 + $0xc0] ss:$2 sm:$0xff]  ;;  %v1426_v28 = vld [vmem:[#allocation2 + $0xf0] ss:$2 sm:$0xff] }
 0x1a3   : > { %v670_v24 = vmax.f32 %v637_v21, 0.0  ;;  %v1544_v21 = vld [vmem:[#allocation2 + $0x91] ss:$2 sm:$0xff]  ;;  %v1434_v22 = vpack.c.bf16 %v1424_v17, %v1422_v20  ;;  %v1428_v53 = vld [vmem:[#allocation2 + $0x120] ss:$2 sm:$0xff] }
 0x1a4   : > { %v1556_v23 = vpack.c.bf16 %v1546_v18, %v1544_v21  ;;  %v2762_v17 = vld [vmem:[%s3427_s6 + $0x20] sm:$0xff]  ;;  %v2769_v18 = vld [vmem:[%s3429_s8 + $0x18] sm:$0xff] }
 0x1a5   : > { %703 = vst [vmem:[#allocation2 + $0x189] sm:$0xff] %v670_v24  ;;  %v1666_v24 = vld [vmem:[#allocation2 + $0x92] ss:$2 sm:$0xff] }
 0x1a6   : > { %v1678_v25 = vpack.c.bf16 %v1668_v19, %v1666_v24  ;;  %v2768_v24 = vld [vmem:[%s3429_s8 + $0x10] sm:$0xff] }
 0x1ac   : > { %v1432_v36 = vld [vmem:[#allocation2 + $0x180] ss:$2 sm:$0xff]  ;;  %v1554_v37 = vld [vmem:[#allocation2 + $0x181] ss:$2 sm:$0xff] }
 0x1ad   : > { %v1676_v39 = vld [vmem:[#allocation2 + $0x182] ss:$2 sm:$0xff]  ;;  %v1436_v45 = vpack.c.bf16 %v1432_v36, %v1430_v43  ;;  %v1558_v47 = vpack.c.bf16 %v1554_v37, %v1552_v44 }
 0x1ae   : > { %v1904_v37 = vld [vmem:[%s3321_s15] sm:$0xff]  ;;  %v2759_v43 = vld [vmem:[%s3427_s6 + $0x8] sm:$0xff] }
 0x1af   : > { %1149 = vmatmul.bf16.gmra.mxu1 %v1068_v30  ;;  %1271 = vmatmul.bf16.gmra.mxu2 %v1190_v31  ;;  %v1435_v30 = vpack.c.bf16 %v1428_v53, %v1426_v28  ;;  %v1557_v31 = vpack.c.bf16 %v1550_v26, %v1548_v29  ;;  %v2760_v28 = vld [vmem:[%s3427_s6 + $0x10] sm:$0xff]  ;;  %v2767_v29 = vld [vmem:[%s3429_s8 + $0x8] sm:$0xff] }
 0x1b0   : > { %1393 = vmatmul.bf16.gmra.mxu3 %v1312_v33  ;;  %v1679_v33 = vpack.c.bf16 %v1672_v27, %v1670_v32 }
 0x1bf   : > { %1154 = vmatmul.bf16.gmra.mxu1 %v1069_v48  ;;  %1276 = vmatmul.bf16.gmra.mxu2 %v1191_v49  ;;  %v1674_v48 = vld [vmem:[#allocation2 + $0x152] ss:$2 sm:$0xff] }
 0x1c0   : > { %1398 = vmatmul.bf16.gmra.mxu3 %v1313_v51  ;;  %v2773_v49 = vld [vmem:[%s3429_s8 + $0x38] sm:$0xff]  ;;  %v1680_v50 = vpack.c.bf16 %v1676_v39, %v1674_v48  ;;  %v1905_v39 = vld [vmem:[%s3321_s15 + $0x8] sm:$0xff] }
 0x1c1   : > { %1984 = vmatpush.bf16.msrb.mxu2 %v2773_v49 }
 0x1cc   : > { %v843_v2 = vpop.f32.mrf.mxu1 }
 0x1cf   : > { %1159 = vmatmul.bf16.gmra.mxu1 %v1070_v62  ;;  %1281 = vmatmul.bf16.gmra.mxu2 %v1192_v63  ;;  %v2772_v62 = vld [vmem:[%s3429_s8 + $0x30] sm:$0xff] }
 0x1d0   : > { %1403 = vmatmul.bf16.gmra.mxu3 %v1314_v1  ;;  %1985 = vmatpush.bf16.msrb.mxu2 %v2772_v62  ;;  %v1906_v62 = vld [vmem:[%s3321_s15 + $0x10] sm:$0xff] }
 0x1d2   : > { %v920_v3 = vpop.f32.mrf.mxu2 }
 0x1d3   : > { %v921_v5 = vadd.f32 %v920_v3, %v843_v2  ;;  %v1034_v6 = vpop.f32.mrf.mxu3  ;;  %v2764_v3 = vld [vmem:[%s3427_s6 + $0x30] sm:$0xff] }
 0x1d4   : > { %v3245_v34 = vpop.f32.mrf.mxu1  ;;  %1876 = vmatpush.bf16.msrb.mxu1 %v2764_v3 }
 0x1d5   : > { %v3243_v7 = vadd.f32 %v1034_v6, %v921_v5  ;;  %v2771_v5 = vld [vmem:[%s3429_s8 + $0x28] sm:$0xff] }
 0x1d6   : > { %1986 = vmatpush.bf16.msrb.mxu2 %v2771_v5 }
 0x1da   : > { %v3247_v35 = vpop.f32.mrf.mxu2  ;;  %1987 = vmatpush.bf16.msrb.mxu2 %v2770_v12 }
 0x1db   : > { %v3249_v38 = vpop.f32.mrf.mxu3 }
 0x1de   : > { %1988 = vmatpush.bf16.msrb.mxu2 %v2769_v18 }
 0x1df   : > { %1510 = vmatmul.bf16.vlgmr.msra.gmra.mxu1 %v1433_v13  ;;  %1632 = vmatmul.bf16.vlgmr.msra.gmra.mxu2 %v1555_v14 }
 0x1e0   : > { %1754 = vmatmul.bf16.vlgmr.msra.gmra.mxu3 %v1677_v16 }
 0x1e2   : > { %1989 = vmatpush.bf16.msrb.mxu2 %v2768_v24 }
 0x1e6   : > { %1990 = vmatpush.bf16.msrb.mxu2 %v2767_v29 }
 0x1ef   : > { %1515 = vmatmul.bf16.gmra.mxu1 %v1434_v22  ;;  %1637 = vmatmul.bf16.gmra.mxu2 %v1556_v23 }
 0x1f0   : > { %1759 = vmatmul.bf16.gmra.mxu3 %v1678_v25 }
 0x1ff   : > { %1520 = vmatmul.bf16.gmra.mxu1 %v1435_v30  ;;  %1642 = vmatmul.bf16.gmra.mxu2 %v1557_v31 }
 0x200   : > { %1764 = vmatmul.bf16.gmra.mxu3 %v1679_v33  ;;  %v2766_v33 = vld [vmem:[%s3429_s8] sm:$0xff] }
 0x201   : > { %1991 = vmatpush.bf16.msrb.mxu2 %v2766_v33 }
 0x20c   : > { %v848_v42 = vpop.f32.mrf.mxu1 }
 0x20f   : > { %1525 = vmatmul.bf16.gmra.mxu1 %v1436_v45  ;;  %1647 = vmatmul.bf16.gmra.mxu2 %v1558_v47 }
 0x210   : > { %1769 = vmatmul.bf16.gmra.mxu3 %v1680_v50  ;;  %v2758_v50 = vld [vmem:[%s3427_s6] sm:$0xff] }
 0x212   : > { %v925_v51 = vpop.f32.mrf.mxu2 }
 0x213   : > { %v926_v55 = vadd.f32 %v925_v51, %v848_v42  ;;  %v1039_v56 = vpop.f32.mrf.mxu3  ;;  %v1912_v42 = vpack.c.bf16 %v1905_v39, %v1904_v37 }
 0x214   : > { %v3254_v57 = vpop.f32.mrf.mxu1 }
 0x215   : > { %v3256_v59 = vadd.f32 %v1039_v56, %v926_v55 }
 0x21a   : > { %v3264_v63 = vpop.f32.mrf.mxu2 }
 0x21b   : > { %v3266_v0 = vpop.f32.mrf.mxu3 }
 0x21c   : > { %v1145_v1 = vpop.f32.mrf.mxu1 }
 0x21d   : > { %v1165_v2 = vadd.f32 %v1145_v1, %v3094_v60  ;;  %v2763_v60 = vld [vmem:[%s3427_s6 + $0x28] sm:$0xff]  ;;  %v1907_v1 = vld [vmem:[%s3321_s15 + $0x18] sm:$0xff] }
 0x21e   : > { %1877 = vmatpush.bf16.msrb.mxu1 %v2763_v60 }
 0x21f   : > { %1992 = vmatmul.bf16.vlgmr.msrb.gmra.mxu2 %v1912_v42 }
 0x222   : > { %v1267_v6 = vpop.f32.mrf.mxu2  ;;  %1878 = vmatpush.bf16.msrb.mxu1 %v2762_v17 }
 0x223   : > { %v1287_v8 = vadd.f32 %v1267_v6, %v1165_v2  ;;  %v1389_v9 = vpop.f32.mrf.mxu3  ;;  %v1913_v2 = vpack.c.bf16 %v1907_v1, %v1906_v62 }
 0x224   : > { %v3275_v10 = vpop.f32.mrf.mxu1 }
 0x225   : > { %v3277_v11 = vadd.f32 %v1389_v9, %v1287_v8 }
 0x22a   : > { %v1269_v13 = vpop.f32.mrf.mxu2 }
 0x22b   : > { %v3285_v14 = vpop.f32.mrf.mxu3 }
 0x22c   : > { %v1150_v15 = vpop.f32.mrf.mxu1 }
 0x22d   : > { %v1167_v16 = vadd.f32 %v1150_v15, %v3197_v4  ;;  %v2761_v4 = vld [vmem:[%s3427_s6 + $0x18] sm:$0xff] }
 0x22e   : > { %1879 = vmatpush.bf16.msrb.mxu1 %v2761_v4 }
 0x22f   : > { %1997 = vmatmul.bf16.gmra.mxu2 %v1913_v2 }
 0x232   : > { %v1272_v19 = vpop.f32.mrf.mxu2  ;;  %1880 = vmatpush.bf16.msrb.mxu1 %v2760_v28 }
 0x233   : > { %v1289_v20 = vadd.f32 %v1272_v19, %v1167_v16  ;;  %v1394_v21 = vpop.f32.mrf.mxu3  ;;  %v1908_v19 = vld [vmem:[%s3321_s15 + $0x20] sm:$0xff] }
 0x234   : > { %v3294_v22 = vpop.f32.mrf.mxu1 }
 0x235   : > { %v3296_v23 = vadd.f32 %v1394_v21, %v1289_v20  ;;  %v1909_v20 = vld [vmem:[%s3321_s15 + $0x28] sm:$0xff] }
 0x236   : > { %1881 = vmatpush.bf16.msrb.mxu1 %v2759_v43  ;;  %v1914_v4 = vpack.c.bf16 %v1909_v20, %v1908_v19 }
 0x23a   : > { %v3304_v25 = vpop.f32.mrf.mxu2  ;;  %1882 = vmatpush.bf16.msrb.mxu1 %v2758_v50 }
 0x23b   : > { %v3306_v53 = vpop.f32.mrf.mxu3 }
 0x23c   : > { %v1155_v26 = vpop.f32.mrf.mxu1 }
 0x23d   : > { %v1169_v27 = vadd.f32 %v1155_v26, %v3243_v7 }
 0x23f   : > { %2002 = vmatmul.bf16.gmra.mxu2 %v1914_v4 }
 0x242   : > { %v1277_v30 = vpop.f32.mrf.mxu2 }
 0x243   : > { %v1291_v31 = vadd.f32 %v1277_v30, %v1169_v27  ;;  %v1399_v32 = vpop.f32.mrf.mxu3 }
 0x244   : > { %v3323_v7 = vpop.f32.mrf.mxu1 }
 0x245   : > { %v3328_v36 = vadd.f32 %v1399_v32, %v1291_v31 }
 0x24a   : > { %v3335_v44 = vpop.f32.mrf.mxu2 }
 0x24b   : > { %v3337_v45 = vpop.f32.mrf.mxu3 }
 0x24c   : > { %v1160_v47 = vpop.f32.mrf.mxu1 }
 0x24d   : > { %v1171_v48 = vadd.f32 %v1160_v47, %v3256_v59  ;;  %v913_v59 = vadd.f32 %v3174_v41, %v3172_v40  ;;  %v3364_v41 = vld [vmem:[%s3426_s5] ss:$0 sm:$0xff]  ;;  %v1910_v47 = vld [vmem:[%s3321_s15 + $0x30] sm:$0xff] }
 0x24f   : > { %v1045_v8 = vadd.f32 %v3176_v46, %v913_v59 }
 0x251   : > { %v1166_v9 = vadd.f32 %v3275_v10, %v1045_v8 }
 0x252   : > { %v1282_v49 = vpop.f32.mrf.mxu2 }
 0x253   : > { %v1293_v51 = vadd.f32 %v1282_v49, %v1171_v48  ;;  %v1404_v55 = vpop.f32.mrf.mxu3  ;;  %v1288_v12 = vadd.f32 %v1269_v13, %v1166_v9  ;;  %v1911_v48 = vld [vmem:[%s3321_s15 + $0x38] sm:$0xff] }
 0x254   : > { %v3343_v56 = vpop.f32.mrf.mxu1  ;;  %v1915_v49 = vpack.c.bf16 %v1911_v48, %v1910_v47 }
 0x255   : > { %v3345_v61 = vadd.f32 %v1404_v55, %v1293_v51  ;;  %v1410_v21 = vadd.f32 %v3285_v14, %v1288_v12  ;;  %v923_v55 = vadd.f32 %v3247_v35, %v3245_v34 }
 0x256   : > { %2007 = vmatmul.bf16.gmra.mxu2 %v1915_v49 }
 0x257   : > { %v1049_v59 = vadd.f32 %v3249_v38, %v923_v55 }
 0x25a   : > { %v3349_v3 = vpop.f32.mrf.mxu2 }
 0x25b   : > { %v3353_v5 = vpop.f32.mrf.mxu3 }
 0x25c   : > { %v1511_v6 = vpop.f32.mrf.mxu1 }
 0x25d   : > { %v1531_v15 = vadd.f32 %v1511_v6, %v3277_v11  ;;  %v918_v11 = vadd.f32 %v3239_v54, %v3237_v52 }
 0x25f   : > { %v1047_v28 = vadd.f32 %v3241_v58, %v918_v11 }
 0x261   : > { %v1168_v30 = vadd.f32 %v3294_v22, %v1047_v28 }
 0x262   : > { %v1633_v60 = vpop.f32.mrf.mxu2 }
 0x263   : > { %v1755_v16 = vpop.f32.mrf.mxu3  ;;  %v1653_v18 = vadd.f32 %v1633_v60, %v1531_v15  ;;  %v1290_v37 = vadd.f32 %v3304_v25, %v1168_v30 }
 0x264   : > { %v1513_v17 = vpop.f32.mrf.mxu1 }
 0x265   : > { %v1775_v40 = vadd.f32 %v1755_v16, %v1653_v18  ;;  %v1532_v46 = vadd.f32 %v1513_v17, %v1410_v21  ;;  %v1412_v58 = vadd.f32 %v3306_v53, %v1290_v37  ;;  %v1170_v53 = vadd.f32 %v3323_v7, %v1049_v59 }
 0x266   : > { %v928_v7 = vadd.f32 %v3264_v63, %v3254_v57 }
 0x267   : > { %v1787_v27 = vadd.f32 %v3364_v41, %v1775_v40  ;;  %v1292_v12 = vadd.f32 %v3335_v44, %v1170_v53 }
 0x269   : > { %v1795_v31 = vmax.f32 %v1787_v27, 0.0  ;;  %v1414_v18 = vadd.f32 %v3337_v45, %v1292_v12 }
 0x26a   : > { %v1635_v10 = vpop.f32.mrf.mxu2 }
 0x26b   : > { %v1654_v13 = vadd.f32 %v1635_v10, %v1532_v46  ;;  %v1757_v24 = vpop.f32.mrf.mxu3 }
 0x26c   : > { %v1516_v26 = vpop.f32.mrf.mxu1 }
 0x26d   : > { %v1776_v14 = vadd.f32 %v1757_v24, %v1654_v13  ;;  %v1533_v54 = vadd.f32 %v1516_v26, %v3296_v23 }
 0x26f   : > { %v1788_v29 = vadd.f32 %v3364_v41, %v1776_v14 }
 0x271   : > { %v1796_v32 = vmax.f32 %v1788_v29, 0.0 }
 0x272   : > { %v1638_v33 = vpop.f32.mrf.mxu2 }
 0x273   : > { %v1803_v52 = vpack.c.bf16 %v1796_v32, %v1795_v31  ;;  %v1760_v39 = vpop.f32.mrf.mxu3  ;;  %v1655_v43 = vadd.f32 %v1638_v33, %v1533_v54 }
 0x274   : > { %v1518_v42 = vpop.f32.mrf.mxu1 }
 0x275   : > { %1883 = vmatmul.bf16.vlgmr.msrb.gmra.mxu1 %v1803_v52  ;;  %v1777_v50 = vadd.f32 %v1760_v39, %v1655_v43  ;;  %v1534_v51 = vadd.f32 %v1518_v42, %v1412_v58  ;;  %v2786_v43 = vld [vmem:[%s3428_s7] ss:$0 sm:$0xff] }
 0x277   : > { %v1789_v23 = vadd.f32 %v3364_v41, %v1777_v50 }
 0x279   : > { %v1797_v8 = vmax.f32 %v1789_v23, 0.0 }
 0x27a   : > { %v1640_v22 = vpop.f32.mrf.mxu2 }
 0x27b   : > { %v1656_v25 = vadd.f32 %v1640_v22, %v1534_v51  ;;  %v1762_v62 = vpop.f32.mrf.mxu3 }
 0x27c   : > { %v1521_v1 = vpop.f32.mrf.mxu1 }
 0x27d   : > { %v1778_v2 = vadd.f32 %v1762_v62, %v1656_v25  ;;  %v1535_v15 = vadd.f32 %v1521_v1, %v3328_v36  ;;  %v1051_v36 = vadd.f32 %v3266_v0, %v928_v7 }
 0x27f   : > { %v1790_v6 = vadd.f32 %v3364_v41, %v1778_v2  ;;  %v1172_v11 = vadd.f32 %v3343_v56, %v1051_v36 }
 0x281   : > { %v1798_v9 = vmax.f32 %v1790_v6, 0.0  ;;  %v1294_v26 = vadd.f32 %v3349_v3, %v1172_v11 }
 0x282   : > { %v1643_v60 = vpop.f32.mrf.mxu2 }
 0x283   : > { %v1765_v34 = vpop.f32.mrf.mxu3  ;;  %v1804_v35 = vpack.c.bf16 %v1798_v9, %v1797_v8  ;;  %v1657_v17 = vadd.f32 %v1643_v60, %v1535_v15  ;;  %v1416_v29 = vadd.f32 %v3353_v5, %v1294_v26  ;;  %v2785_v5 = vld [vmem:[%s3430_s9] ss:$0 sm:$0xff] }
 0x284   : > { %v1523_v16 = vpop.f32.mrf.mxu1 }
 0x285   : > { %1888 = vmatmul.bf16.gmra.mxu1 %v1804_v35  ;;  %v1779_v19 = vadd.f32 %v1765_v34, %v1657_v17  ;;  %v1536_v38 = vadd.f32 %v1523_v16, %v1414_v18 }
 0x287   : > { %v1791_v44 = vadd.f32 %v3364_v41, %v1779_v19 }
 0x289   : > { %v1799_v13 = vmax.f32 %v1791_v44, 0.0 }
 0x28a   : > { %v1645_v20 = vpop.f32.mrf.mxu2 }
 0x28b   : > { %v1658_v21 = vadd.f32 %v1645_v20, %v1536_v38  ;;  %v1767_v4 = vpop.f32.mrf.mxu3 }
 0x28c   : > { %v1526_v40 = vpop.f32.mrf.mxu1 }
 0x28d   : > { %v1780_v46 = vadd.f32 %v1767_v4, %v1658_v21  ;;  %v1537_v27 = vadd.f32 %v1526_v40, %v3345_v61 }
 0x28f   : > { %v1792_v10 = vadd.f32 %v3364_v41, %v1780_v46 }
 0x291   : > { %v1800_v45 = vmax.f32 %v1792_v10, 0.0 }
 0x292   : > { %v1648_v24 = vpop.f32.mrf.mxu2 }
 0x293   : > { %v1770_v57 = vpop.f32.mrf.mxu3  ;;  %v1805_v63 = vpack.c.bf16 %v1800_v45, %v1799_v13  ;;  %v1659_v14 = vadd.f32 %v1648_v24, %v1537_v27 }
 0x294   : > { %v1528_v28 = vpop.f32.mrf.mxu1 }
 0x295   : > { %1893 = vmatmul.bf16.gmra.mxu1 %v1805_v63  ;;  %v1781_v30 = vadd.f32 %v1770_v57, %v1659_v14  ;;  %v1538_v0 = vadd.f32 %v1528_v28, %v1416_v29 }
 0x297   : > { %v1793_v56 = vadd.f32 %v3364_v41, %v1781_v30 }
 0x299   : > { %v1801_v52 = vmax.f32 %v1793_v56, 0.0 }
 0x29a   : > { %v1650_v31 = vpop.f32.mrf.mxu2 }
 0x29b   : > { %v1660_v32 = vadd.f32 %v1650_v31, %v1538_v0  ;;  %v1772_v33 = vpop.f32.mrf.mxu3 }
 0x29d   : > { %v1782_v37 = vadd.f32 %v1772_v33, %v1660_v32 }
 0x29f   : > { %v1794_v3 = vadd.f32 %v3364_v41, %v1782_v37 }
 0x2a1   : > { %v1802_v61 = vmax.f32 %v1794_v3, 0.0 }
 0x2a2   : > { %v1993_v39 = vpop.f32.mrf.mxu2 }
 0x2a3   : > { %v1806_v54 = vpack.c.bf16 %v1802_v61, %v1801_v52  ;;  %v1994_v47 = vadd.f32 %v2785_v5, %v1993_v39 }
 0x2a5   : > { %1898 = vmatmul.bf16.gmra.mxu1 %v1806_v54 }
 0x2aa   : > { %v1995_v42 = vpop.f32.mrf.mxu2 }
 0x2ab   : > { %v1996_v22 = vadd.f32 %v2785_v5, %v1995_v42 }
 0x2b2   : > { %v1998_v41 = vpop.f32.mrf.mxu2 }
 0x2b3   : > { %v1999_v23 = vadd.f32 %v2785_v5, %v1998_v41 }
 0x2ba   : > { %v2000_v1 = vpop.f32.mrf.mxu2 }
 0x2bb   : > { %v2001_v60 = vadd.f32 %v2785_v5, %v2000_v1 }
 0x2c2   : > { %v2003_v9 = vpop.f32.mrf.mxu2 }
 0x2c3   : > { %v2004_v35 = vadd.f32 %v2785_v5, %v2003_v9 }
 0x2ca   : > { %v2005_v18 = vpop.f32.mrf.mxu2 }
 0x2cb   : > { %v2006_v7 = vadd.f32 %v2785_v5, %v2005_v18 }
 0x2d9   : > { %v2008_v40 = vpop.f32.mrf.mxu2 }
 0x2da   : > { %v2009_v46 = vadd.f32 %v2785_v5, %v2008_v40 }
 0x2e1   : > { %v2010_v45 = vpop.f32.mrf.mxu2 }
 0x2e2   : > { %v2011_v26 = vadd.f32 %v2785_v5, %v2010_v45 }
 0x2f2   : > { %v1884_v48 = vpop.f32.mrf.mxu1 }
 0x2f3   : > { %v1885_v58 = vadd.f32 %v2786_v43, %v1884_v48 }
 0x2f5   : > { %v2013_v49 = vadd.f32 %v1994_v47, %v1885_v58 }
 0x2f7   : > { %v2021_v50 = vmax.f32 %v2013_v49, 0.0 }
 0x2f9   : > { %2029 = vst [vmem:[%s3408_s30] sm:$0xff] %v2021_v50 }
 0x2fa   : > { %v1886_v51 = vpop.f32.mrf.mxu1 }
 0x2fb   : > { %v1887_v55 = vadd.f32 %v2786_v43, %v1886_v51 }
 0x2fd   : > { %v2014_v25 = vadd.f32 %v1996_v22, %v1887_v55 }
 0x2ff   : > { %v2022_v62 = vmax.f32 %v2014_v25, 0.0 }
 0x301   : > { %2030 = vst [vmem:[%s3408_s30 + $0x8] sm:$0xff] %v2022_v62 }
 0x302   : > { %v1889_v2 = vpop.f32.mrf.mxu1 }
 0x303   : > { %v1890_v59 = vadd.f32 %v2786_v43, %v1889_v2 }
 0x305   : > { %v2015_v6 = vadd.f32 %v1999_v23, %v1890_v59 }
 0x307   : > { %v2023_v53 = vmax.f32 %v2015_v6, 0.0 }
 0x309   : > { %2031 = vst [vmem:[%s3408_s30 + $0x10] sm:$0xff] %v2023_v53 }
 0x30a   : > { %v1891_v8 = vpop.f32.mrf.mxu1 }
 0x30b   : > { %v1892_v12 = vadd.f32 %v2786_v43, %v1891_v8 }
 0x30d   : > { %v2016_v15 = vadd.f32 %v2001_v60, %v1892_v12 }
 0x30f   : > { %v2024_v34 = vmax.f32 %v2016_v15, 0.0 }
 0x311   : > { %2032 = vst [vmem:[%s3408_s30 + $0x18] sm:$0xff] %v2024_v34 }
 0x312   : > { %v1894_v16 = vpop.f32.mrf.mxu1 }
 0x313   : > { %v1895_v17 = vadd.f32 %v2786_v43, %v1894_v16 }
 0x315   : > { %v2017_v19 = vadd.f32 %v2004_v35, %v1895_v17 }
 0x317   : > { %v2025_v38 = vmax.f32 %v2017_v19, 0.0 }
 0x319   : > { %2033 = vst [vmem:[%s3408_s30 + $0x20] sm:$0xff] %v2025_v38 }
 0x31a   : > { %v1896_v20 = vpop.f32.mrf.mxu1 }
 0x31b   : > { %v1897_v21 = vadd.f32 %v2786_v43, %v1896_v20 }
 0x31d   : > { %v2018_v4 = vadd.f32 %v2006_v7, %v1897_v21 }
 0x31f   : > { %v2026_v44 = vmax.f32 %v2018_v4, 0.0 }
 0x321   : > { %2034 = vst [vmem:[%s3408_s30 + $0x28] sm:$0xff] %v2026_v44 }
 0x322   : > { %v1899_v36 = vpop.f32.mrf.mxu1 }
 0x323   : > { %v1900_v10 = vadd.f32 %v2786_v43, %v1899_v36 }
 0x325   : > { %v2019_v11 = vadd.f32 %v2009_v46, %v1900_v10 }
 0x327   : > { %v2027_v13 = vmax.f32 %v2019_v11, 0.0 }
 0x329   : > { %2035 = vst [vmem:[%s3408_s30 + $0x30] sm:$0xff] %v2027_v13 }
 0x32a   : > { %v1901_v24 = vpop.f32.mrf.mxu1 }
 0x32b   : > { %v1902_v27 = vadd.f32 %v2786_v43, %v1901_v24 }
 0x32d   : > { %v2020_v57 = vadd.f32 %v2011_v26, %v1902_v27 }
 0x32f   : > { %v2028_v63 = vmax.f32 %v2020_v57, 0.0 }
 0x331   : > { %2036 = vst [vmem:[%s3408_s30 + $0x38] sm:$0xff] %v2028_v63 }
 0x332 PF: > { %s20_s13 = sadd.s32 1, %s2793_s13  }
 0x333   : > { %p17_p4 = scmp.ge.s32.totalorder %s20_s13, 4  }
 0x335   :  { %19 = sbr.rel (!%p17_p4) target bundleno = 1 (0x1), region = 172 }

</bundles_post_ra>
